<compile_context>
chip_gen: v5e
topology: v5e:2x2
jax: 0.10.0
libtpu: 0.0.40
codegen_flags: <defaults>
</compile_context>

<pallas_src>
import functools

import jax
import jax.numpy as jnp
from jax.experimental import pallas as pl
from jax.experimental.pallas import tpu as pltpu

EPS = 1e-15


# ----------------------------------------------------------------------------
# Pallas kernel: forward pass for a block of G graphs
# ----------------------------------------------------------------------------
def _mincut_kernel(x_ref, adj_ref, cnt_ref,
                   w1_ref, b1_ref,
                   wr1_ref, wroot1_ref, br1_ref,
                   wp_ref, bp_ref,
                   wr2_ref, wroot2_ref, br2_ref,
                   w2_ref, b2_ref, w3_ref, b3_ref,
                   out_ref):
    G, N, Fin = x_ref.shape
    H = w1_ref.shape[1]
    K = wp_ref.shape[1]
    C = w3_ref.shape[1]

    f32 = jnp.float32
    bf16 = jnp.bfloat16
    dot = functools.partial(jnp.dot, preferred_element_type=f32)
    bmm = functools.partial(jnp.einsum, preferred_element_type=f32)

    x = x_ref[...]                                   # [G, N, Fin] f32
    adj = adj_ref[...]                               # [G, N, N]  bf16
    counts = cnt_ref[...]                            # [G, 1, 1]  int32

    # node-validity mask built in-kernel (no [B, N, 1] mask input / DMA)
    node_id = jax.lax.broadcasted_iota(jnp.int32, (G, N, 1), 1)
    mask = (node_id < counts).astype(f32)            # [G, N, 1]

    # lin1 over all G*N rows at once
    h = dot(x.reshape(G * N, Fin), w1_ref[...]) + b1_ref[...]            # [G*N, H]

    # conv1 = DenseGraphConv(aggr='add'): bf16 neighborhood aggregation, then
    # two ACCUMULATED matmuls (rel + root) -- no lane concat, no [G*N,2H] buffer.
    agg = bmm('gnm,gmh->gnh', adj, h.reshape(G, N, H).astype(bf16))      # [G, N, H] f32
    h = (dot(agg.reshape(G * N, H), wr1_ref[...])
         + dot(h, wroot1_ref[...]) + br1_ref[...])                       # [G*N, H]

    # pool2: cluster logits + softmax over K (EUP reciprocal for the denom)
    s_logits = dot(h, wp_ref[...]) + bp_ref[...]                         # [G*N, K]
    s_exp = jnp.exp(s_logits - jnp.max(s_logits, axis=-1, keepdims=True))
    s = s_exp * pl.reciprocal(jnp.sum(s_exp, axis=-1, keepdims=True), approx=True)

    # dense_mincut_pool: mask cluster assignments (masking h is redundant --
    # sm is already zero on padded rows, so S^T X is unaffected).
    sm = s.reshape(G, N, K) * mask                                       # [G, N, K]
    sm_bf = sm.astype(bf16)
    h_bf = h.reshape(G, N, H).astype(bf16)

    # coarsened features: S^T X  (bf16 in, f32 accumulate)
    out = bmm('gnk,gnh->gkh', sm_bf, h_bf)                               # [G, K, H]

    # A @ [S | 1]: the ones column folds the degree row-sum into the same
    # MXU pass (no f32 upcast of adj, no lane reduction over [G,N,N]).
    ones_col = jnp.ones((G, N, 1), bf16)
    sm_ext = jnp.concatenate([sm_bf, ones_col], axis=-1)                 # [G, N, K+1]
    a_s_ext = bmm('gnm,gmk->gnk', adj, sm_ext)                           # [G, N, K+1] f32
    a_s = a_s_ext[..., :K]                                               # A @ S
    deg = a_s_ext[..., K:]                                               # [G, N, 1]

    out_adj = bmm('gnk,gnj->gkj', sm_bf, a_s.astype(bf16))               # S^T A S [G,K,K]

    row = jax.lax.broadcasted_iota(jnp.int32, (1, K, K), 1)
    col = jax.lax.broadcasted_iota(jnp.int32, (1, K, K), 2)
    eye = row == col

    # mincut loss per graph: -trace(S^T A S) / trace(S^T D S)
    mincut_num = jnp.sum(jnp.sum(jnp.where(eye, out_adj, 0.0),
                                 axis=-1, keepdims=True),
                         axis=-2, keepdims=True)                         # [G,1,1]
    mincut_den = jnp.sum(jnp.sum(deg * sm * sm, axis=-1, keepdims=True),
                         axis=-2, keepdims=True)                         # [G,1,1]
    mincut_loss = -(mincut_num * pl.reciprocal(mincut_den, approx=True))

    # orthogonality loss per graph: || S^T S / ||S^T S||_F - I_k / sqrt(k) ||_F
    ss = bmm('gnk,gnj->gkj', sm_bf, sm_bf)                               # [G,K,K]
    ss_sq = jnp.sum(jnp.sum(ss * ss, axis=-1, keepdims=True),
                    axis=-2, keepdims=True)                              # [G,1,1]
    diff = ss * jax.lax.rsqrt(ss_sq) - jnp.where(eye, 1.0 / (float(K) ** 0.5), 0.0)
    ortho_loss = jnp.sqrt(jnp.sum(jnp.sum(diff * diff, axis=-1, keepdims=True),
                                  axis=-2, keepdims=True))               # [G,1,1]

    # zero diagonal; fold symmetric D^-1/2 normalization into conv2's aggregation:
    # (D^-1/2 A_c D^-1/2) @ out  ==  dinv * (A_c @ (dinv * out))
    out_adj = jnp.where(eye, 0.0, out_adj)
    dinv = pl.reciprocal(
        jnp.sqrt(jnp.sum(out_adj, axis=-1, keepdims=True)) + EPS, approx=True)  # [G,K,1]
    agg2 = dinv * bmm('gkj,gjh->gkh', out_adj, dinv * out)               # [G,K,H]

    # conv2 on coarsened graph (two accumulated rel/root matmuls)
    h2 = (dot(agg2.reshape(G * K, H), wr2_ref[...])
          + dot(out.reshape(G * K, H), wroot2_ref[...]) + br2_ref[...])  # [G*K, H]

    # readout: sum over clusters, MLP head, log_softmax
    xsum = jnp.sum(h2.reshape(G, K, H), axis=1)                          # [G, H]
    z = jnp.maximum(dot(xsum, w2_ref[...]) + b2_ref[...], 0.0)           # relu(lin2)
    z = dot(z, w3_ref[...]) + b3_ref[...]                                # [G, C]
    zs = z - jnp.max(z, axis=-1, keepdims=True)
    logp = zs - jnp.log(jnp.sum(jnp.exp(zs), axis=-1, keepdims=True))

    # pack per-graph outputs into one slab; pad to a 128-lane-dense store
    slab = jnp.concatenate(
        [logp, mincut_loss.reshape(G, 1), ortho_loss.reshape(G, 1)], axis=-1)  # [G, C+2]
    lanes = out_ref.shape[-1]
    pad = lanes - (C + 2)
    if pad > 0:
        slab = jnp.concatenate([slab, jnp.zeros((G, pad), f32)], axis=-1)
    out_ref[...] = slab.reshape(out_ref.shape)


# ----------------------------------------------------------------------------
# Wrapper
# ----------------------------------------------------------------------------
_WEIGHT_ORDER = ("w1", "b1", "wr1", "wroot1", "br1", "wp", "bp",
                 "wr2", "wroot2", "br2", "w2", "b2", "w3", "b3")


def _pick_block(num_graphs, target, n, fin, hidden, centers,
                budget_bytes=24 << 20):
    """Largest divisor of num_graphs that (a) keeps >=2 grid steps (megacore /
    pipelining), (b) fits a per-generation-safe VMEM budget, (c) <= target."""
    per_graph = (2 * 2 * n * n                       # double-buffered bf16 adj block
                 + 2 * 4 * n * fin                   # double-buffered f32 feature block
                 + 4 * n * (6 * hidden + 2 * (centers + 1)))   # live f32 intermediates
    vmem_cap = max(1, budget_bytes // max(per_graph, 1))
    two_step_cap = max(1, num_graphs // 2)           # keep >=2 grid steps when possible
    g = max(1, min(num_graphs, target, vmem_cap, two_step_cap))
    while num_graphs % g:
        g -= 1
    return g


def mincut_net_forward(x_dense, adj, counts, params, graphs_per_block=8):
    B, N, Fin = x_dense.shape
    H = params["w1"].shape[1]
    K = params["wp"].shape[1]
    C = params["w3"].shape[1]
    G = _pick_block(B, graphs_per_block, N, Fin, H, K)

    # adjacency should already be bf16 (built at the source); only cast if not.
    adj_bf16 = adj if adj.dtype == jnp.bfloat16 else adj.astype(jnp.bfloat16)
    cnt = counts.astype(jnp.int32).reshape(B, 1, 1)

    weights = [params[name] for name in _WEIGHT_ORDER]

    data_specs = [
        pl.BlockSpec((G, N, Fin), lambda b: (b, 0, 0)),
        pl.BlockSpec((G, N, N), lambda b: (b, 0, 0)),
        pl.BlockSpec((G, 1, 1), lambda b: (b, 0, 0)),
    ]
    weight_specs = [pl.BlockSpec(w.shape, lambda b: (0, 0)) for w in weights]

    num_blocks = B // G
    lanes = (C + 2) + ((-(C + 2)) % 128)             # lane-dense (128-padded) output
    out_shape = jax.ShapeDtypeStruct((num_blocks, G, lanes), jnp.float32)
    out_spec = pl.BlockSpec((1, G, lanes), lambda b: (b, 0, 0))

    # explicit scoped-VMEM limit: raise v5e's 16 MiB default, stay within v7x's
    # 64 MiB physical VMEM.
    adj_block = G * N * N * 2
    x_block = G * N * Fin * 4
    interm = G * N * 4 * (6 * H + 2 * (K + 1))
    wbytes = sum(int(w.size) * 4 for w in weights)
    vmem_limit = int(min(48 << 20,
                         max(32 << 20,
                             2 * (adj_block + x_block) + interm + 2 * wbytes + (4 << 20))))

    slab = pl.pallas_call(
        _mincut_kernel,
        out_shape=out_shape,
        grid_spec=pltpu.PrefetchScalarGridSpec(
            num_scalar_prefetch=0,
            grid=(num_blocks,),
            in_specs=data_specs + weight_specs,
            out_specs=out_spec,
        ),
        compiler_params=pltpu.CompilerParams(
            dimension_semantics=("parallel",),       # shard graph blocks over v7x's 2 TCs
            vmem_limit_bytes=vmem_limit,
        ),
    )(x_dense, adj_bf16, cnt, *weights)

    slab = slab[:, :, :C + 2].reshape(B, C + 2)
    logp = slab[:, :C]
    # module returns (log_softmax(x), mincut_loss2, ortho_loss2); losses are batch means.
    # NOTE: an empty (all-padding) graph would produce NaN losses, same as the
    # PyTorch reference -- callers must not include empty graphs in the batch.
    mincut_loss = jnp.mean(slab[:, C])
    ortho_loss = jnp.mean(slab[:, C + 1])
    return logp, mincut_loss, ortho_loss


# ----------------------------------------------------------------------------
# Glue: to_dense_batch / to_dense_adj (scatter, plain JAX) and param init
# ----------------------------------------------------------------------------
def to_dense_batch(x, batch, num_graphs, max_nodes):
    total = x.shape[0]
    counts = jax.ops.segment_sum(jnp.ones((total,), jnp.int32), batch,
                                 num_segments=num_graphs)
    offsets = jnp.concatenate(
        [jnp.zeros((1,), jnp.int32), jnp.cumsum(counts)[:-1].astype(jnp.int32)])
    pos = jnp.arange(total, dtype=jnp.int32) - offsets[batch]
    x_dense = jnp.zeros((num_graphs, max_nodes, x.shape[1]),
                        x.dtype).at[batch, pos].set(x)
    return x_dense, counts, pos


def to_dense_adj(edge_index, batch, pos, num_graphs, max_nodes):
    # Built directly in bf16: exact for edge multiplicities <= 256 and avoids a
    # separate f32->bf16 cast pass over the largest tensor in the pipeline.
    src, dst = edge_index[0], edge_index[1]
    b_e = batch[src]
    adj = jnp.zeros((num_graphs, max_nodes, max_nodes), jnp.bfloat16)
    adj = adj.at[b_e, pos[src], pos[dst]].add(1.0)
    return adj


def init_params(key, in_channels, out_channels, hidden=32, num_centers=16):
    keys = jax.random.split(key, 14)

    def lin_w(k, fan_in, fan_out):
        bound = 1.0 / (fan_in ** 0.5)
        return jax.random.uniform(k, (fan_in, fan_out), jnp.float32, -bound, bound)

    def lin_b(k, fan_in, fan_out):
        bound = 1.0 / (fan_in ** 0.5)
        return jax.random.uniform(k, (1, fan_out), jnp.float32, -bound, bound)

    H, K = hidden, num_centers
    return {
        "w1": lin_w(keys[0], in_channels, H), "b1": lin_b(keys[1], in_channels, H),
        "wr1": lin_w(keys[2], H, H), "br1": lin_b(keys[3], H, H),
        "wroot1": lin_w(keys[4], H, H),
        "wp": lin_w(keys[5], H, K), "bp": lin_b(keys[6], H, K),
        "wr2": lin_w(keys[7], H, H), "br2": lin_b(keys[8], H, H),
        "wroot2": lin_w(keys[9], H, H),
        "w2": lin_w(keys[10], H, H), "b2": lin_b(keys[11], H, H),
        "w3": lin_w(keys[12], H, out_channels), "b3": lin_b(keys[13], H, out_channels),
    }


# TODO(synk): torch.isnan debug prints in the reference forward have no effect
# on outputs and are omitted.

if __name__ == "__main__":
    key = jax.random.PRNGKey(0)
    kx, kp = jax.random.split(key)

    B = 8                      # graphs
    nodes_per_graph = 8        # keep N a multiple of 8 for clean layout merges
    in_channels, out_channels, hidden, num_centers = 4, 4, 32, 16
    total_nodes = B * nodes_per_graph

    x = jax.random.normal(kx, (total_nodes, in_channels), jnp.float32)
    batch = jnp.repeat(jnp.arange(B, dtype=jnp.int32), nodes_per_graph)

    # bidirectional ring within each graph
    src_list, dst_list = [], []
    for g in range(B):
        base = g * nodes_per_graph
        for i in range(nodes_per_graph):
            j = (i + 1) % nodes_per_graph
            src_list += [base + i, base + j]
            dst_list += [base + j, base + i]
    edge_index = jnp.array([src_list, dst_list], dtype=jnp.int32)

    params = init_params(kp, in_channels, out_channels, hidden, num_centers)

    x_dense, counts, pos = to_dense_batch(x, batch, B, nodes_per_graph)
    adj = to_dense_adj(edge_index, batch, pos, B, nodes_per_graph)

    logp, mincut_loss, ortho_loss = mincut_net_forward(
        x_dense, adj, counts, params, graphs_per_block=4)
    jax.block_until_ready((logp, mincut_loss, ortho_loss))
    print("KERNEL_OK")
</pallas_src>

<mosaic_0001>
module attributes {stable_mosaic.version = 11 : i64} {
  func.func @_mincut_kernel(%arg0: i32, %arg1: memref<4x8x4xf32, #tpu.memory_space<vmem>>, %arg2: memref<4x8x8xbf16, #tpu.memory_space<vmem>>, %arg3: memref<4x1x1xi32, #tpu.memory_space<vmem>>, %arg4: memref<4x32xf32, #tpu.memory_space<vmem>>, %arg5: memref<1x32xf32, #tpu.memory_space<vmem>>, %arg6: memref<32x32xf32, #tpu.memory_space<vmem>>, %arg7: memref<32x32xf32, #tpu.memory_space<vmem>>, %arg8: memref<1x32xf32, #tpu.memory_space<vmem>>, %arg9: memref<32x16xf32, #tpu.memory_space<vmem>>, %arg10: memref<1x16xf32, #tpu.memory_space<vmem>>, %arg11: memref<32x32xf32, #tpu.memory_space<vmem>>, %arg12: memref<32x32xf32, #tpu.memory_space<vmem>>, %arg13: memref<1x32xf32, #tpu.memory_space<vmem>>, %arg14: memref<32x32xf32, #tpu.memory_space<vmem>>, %arg15: memref<1x32xf32, #tpu.memory_space<vmem>>, %arg16: memref<32x4xf32, #tpu.memory_space<vmem>>, %arg17: memref<1x4xf32, #tpu.memory_space<vmem>>, %arg18: memref<1x4x128xf32, #tpu.memory_space<vmem>>) attributes {dimension_semantics = [#tpu.dimension_semantics<parallel>], iteration_bounds = array<i64: 2>, scalar_prefetch = 0 : i64, scratch_operands = 0 : i64, tpu.core_type = #tpu.core_type<tc>, window_params = [{transform_indices = @transform_0, window_bounds = array<i64: 4, 8, 4>}, {transform_indices = @transform_1, window_bounds = array<i64: 4, 8, 8>}, {transform_indices = @transform_2, window_bounds = array<i64: 4, 1, 1>}, {pipeline_mode = #tpu.pipeline_mode<synchronous>, transform_indices = @transform_3, window_bounds = array<i64: 4, 32>}, {pipeline_mode = #tpu.pipeline_mode<synchronous>, transform_indices = @transform_4, window_bounds = array<i64: 1, 32>}, {pipeline_mode = #tpu.pipeline_mode<synchronous>, transform_indices = @transform_5, window_bounds = array<i64: 32, 32>}, {pipeline_mode = #tpu.pipeline_mode<synchronous>, transform_indices = @transform_6, window_bounds = array<i64: 32, 32>}, {pipeline_mode = #tpu.pipeline_mode<synchronous>, transform_indices = @transform_7, window_bounds = array<i64: 1, 32>}, {pipeline_mode = #tpu.pipeline_mode<synchronous>, transform_indices = @transform_8, window_bounds = array<i64: 32, 16>}, {pipeline_mode = #tpu.pipeline_mode<synchronous>, transform_indices = @transform_9, window_bounds = array<i64: 1, 16>}, {pipeline_mode = #tpu.pipeline_mode<synchronous>, transform_indices = @transform_10, window_bounds = array<i64: 32, 32>}, {pipeline_mode = #tpu.pipeline_mode<synchronous>, transform_indices = @transform_11, window_bounds = array<i64: 32, 32>}, {pipeline_mode = #tpu.pipeline_mode<synchronous>, transform_indices = @transform_12, window_bounds = array<i64: 1, 32>}, {pipeline_mode = #tpu.pipeline_mode<synchronous>, transform_indices = @transform_13, window_bounds = array<i64: 32, 32>}, {pipeline_mode = #tpu.pipeline_mode<synchronous>, transform_indices = @transform_14, window_bounds = array<i64: 1, 32>}, {pipeline_mode = #tpu.pipeline_mode<synchronous>, transform_indices = @transform_15, window_bounds = array<i64: 32, 4>}, {pipeline_mode = #tpu.pipeline_mode<synchronous>, transform_indices = @transform_16, window_bounds = array<i64: 1, 4>}, {transform_indices = @transform_17, window_bounds = array<i64: 1, 4, 128>}]} {
    %c0 = arith.constant 0 : index
    %c0_0 = arith.constant 0 : index
    %c0_1 = arith.constant 0 : index
    %0 = vector.load %arg1[%c0, %c0_0, %c0_1] : memref<4x8x4xf32, #tpu.memory_space<vmem>>, vector<4x8x4xf32>
    %c0_2 = arith.constant 0 : index
    %c0_3 = arith.constant 0 : index
    %c0_4 = arith.constant 0 : index
    %1 = vector.load %arg2[%c0_2, %c0_3, %c0_4] : memref<4x8x8xbf16, #tpu.memory_space<vmem>>, vector<4x8x8xbf16>
    %c0_5 = arith.constant 0 : index
    %c0_6 = arith.constant 0 : index
    %c0_7 = arith.constant 0 : index
    %2 = vector.load %arg3[%c0_5, %c0_6, %c0_7] : memref<4x1x1xi32, #tpu.memory_space<vmem>>, vector<4x1x1xi32>
    %3 = tpu.iota {dimensions = array<i32: 1>} : vector<4x8x1xi32>
    %4 = vector.broadcast %2 : vector<4x1x1xi32> to vector<4x8x1xi32>
    %5 = arith.cmpi slt, %3, %4 : vector<4x8x1xi32>
    %6 = arith.extui %5 : vector<4x8x1xi1> to vector<4x8x1xi32>
    %7 = arith.sitofp %6 : vector<4x8x1xi32> to vector<4x8x1xf32>
    %8 = vector.shape_cast %0 : vector<4x8x4xf32> to vector<32x4xf32>
    %c0_8 = arith.constant 0 : index
    %c0_9 = arith.constant 0 : index
    %9 = vector.load %arg4[%c0_8, %c0_9] : memref<4x32xf32, #tpu.memory_space<vmem>>, vector<4x32xf32>
    %cst = arith.constant dense<0.000000e+00> : vector<32x32xf32>
    %10 = tpu.matmul %8, %9, %cst {dimension_numbers = #tpu.dot_dimension_numbers<[1], [0], [0], [1], [0, 0, 1, 1], [], []>} : vector<32x4xf32>, vector<4x32xf32>, vector<32x32xf32> -> vector<32x32xf32>
    %c0_10 = arith.constant 0 : index
    %c0_11 = arith.constant 0 : index
    %11 = vector.load %arg5[%c0_10, %c0_11] : memref<1x32xf32, #tpu.memory_space<vmem>>, vector<1x32xf32>
    %12 = vector.broadcast %11 : vector<1x32xf32> to vector<32x32xf32>
    %13 = arith.addf %10, %12 : vector<32x32xf32>
    %14 = vector.shape_cast %13 : vector<32x32xf32> to vector<4x8x32xf32>
    %15 = arith.truncf %14 : vector<4x8x32xf32> to vector<4x8x32xbf16>
    "tpu.trace_start"() <{level = 10 : i32, message = "gnm,gmh->gnh"}> : () -> ()
    %cst_12 = arith.constant dense<0.000000e+00> : vector<4x8x32xf32>
    %16 = tpu.matmul %1, %15, %cst_12 {dimension_numbers = #tpu.dot_dimension_numbers<[2], [1], [1], [2], [0, 0, 0, 1, 1, 2], [0], [0]>} : vector<4x8x8xbf16>, vector<4x8x32xbf16>, vector<4x8x32xf32> -> vector<4x8x32xf32>
    "tpu.trace_stop"() : () -> ()
    %17 = vector.shape_cast %16 : vector<4x8x32xf32> to vector<32x32xf32>
    %c0_13 = arith.constant 0 : index
    %c0_14 = arith.constant 0 : index
    %18 = vector.load %arg6[%c0_13, %c0_14] : memref<32x32xf32, #tpu.memory_space<vmem>>, vector<32x32xf32>
    %cst_15 = arith.constant dense<0.000000e+00> : vector<32x32xf32>
    %19 = tpu.matmul %17, %18, %cst_15 {dimension_numbers = #tpu.dot_dimension_numbers<[1], [0], [0], [1], [0, 0, 1, 1], [], []>} : vector<32x32xf32>, vector<32x32xf32>, vector<32x32xf32> -> vector<32x32xf32>
    %c0_16 = arith.constant 0 : index
    %c0_17 = arith.constant 0 : index
    %20 = vector.load %arg7[%c0_16, %c0_17] : memref<32x32xf32, #tpu.memory_space<vmem>>, vector<32x32xf32>
    %cst_18 = arith.constant dense<0.000000e+00> : vector<32x32xf32>
    %21 = tpu.matmul %13, %20, %cst_18 {dimension_numbers = #tpu.dot_dimension_numbers<[1], [0], [0], [1], [0, 0, 1, 1], [], []>} : vector<32x32xf32>, vector<32x32xf32>, vector<32x32xf32> -> vector<32x32xf32>
    %22 = arith.addf %19, %21 : vector<32x32xf32>
    %c0_19 = arith.constant 0 : index
    %c0_20 = arith.constant 0 : index
    %23 = vector.load %arg8[%c0_19, %c0_20] : memref<1x32xf32, #tpu.memory_space<vmem>>, vector<1x32xf32>
    %24 = vector.broadcast %23 : vector<1x32xf32> to vector<32x32xf32>
    %25 = arith.addf %22, %24 : vector<32x32xf32>
    %c0_21 = arith.constant 0 : index
    %c0_22 = arith.constant 0 : index
    %26 = vector.load %arg9[%c0_21, %c0_22] : memref<32x16xf32, #tpu.memory_space<vmem>>, vector<32x16xf32>
    %cst_23 = arith.constant dense<0.000000e+00> : vector<32x16xf32>
    %27 = tpu.matmul %25, %26, %cst_23 {dimension_numbers = #tpu.dot_dimension_numbers<[1], [0], [0], [1], [0, 0, 1, 1], [], []>} : vector<32x32xf32>, vector<32x16xf32>, vector<32x16xf32> -> vector<32x16xf32>
    %c0_24 = arith.constant 0 : index
    %c0_25 = arith.constant 0 : index
    %28 = vector.load %arg10[%c0_24, %c0_25] : memref<1x16xf32, #tpu.memory_space<vmem>>, vector<1x16xf32>
    %29 = vector.broadcast %28 : vector<1x16xf32> to vector<32x16xf32>
    %30 = arith.addf %27, %29 : vector<32x16xf32>
    %cst_26 = arith.constant dense<0xFF800000> : vector<32xf32>
    %31 = vector.multi_reduction <maximumf>, %30, %cst_26 [1] : vector<32x16xf32> to vector<32xf32>
    %32 = vector.shape_cast %31 : vector<32xf32> to vector<32x1xf32>
    %33 = vector.broadcast %32 : vector<32x1xf32> to vector<32x16xf32>
    %34 = arith.subf %30, %33 : vector<32x16xf32>
    %35 = math.exp %34 : vector<32x16xf32>
    %cst_27 = arith.constant dense<0.000000e+00> : vector<32xf32>
    %36 = vector.multi_reduction <add>, %35, %cst_27 [1] : vector<32x16xf32> to vector<32xf32>
    %37 = vector.shape_cast %36 : vector<32xf32> to vector<32x1xf32>
    %38 = tpu.reciprocal %37 {approx = true} : vector<32x1xf32> -> vector<32x1xf32>
    %39 = vector.broadcast %38 : vector<32x1xf32> to vector<32x16xf32>
    %40 = arith.mulf %35, %39 : vector<32x16xf32>
    %41 = vector.shape_cast %40 : vector<32x16xf32> to vector<4x8x16xf32>
    %42 = vector.broadcast %7 : vector<4x8x1xf32> to vector<4x8x16xf32>
    %43 = arith.mulf %41, %42 : vector<4x8x16xf32>
    %44 = arith.truncf %43 : vector<4x8x16xf32> to vector<4x8x16xbf16>
    %45 = vector.shape_cast %25 : vector<32x32xf32> to vector<4x8x32xf32>
    %46 = arith.truncf %45 : vector<4x8x32xf32> to vector<4x8x32xbf16>
    "tpu.trace_start"() <{level = 10 : i32, message = "gnk,gnh->gkh"}> : () -> ()
    %cst_28 = arith.constant dense<0.000000e+00> : vector<4x16x32xf32>
    %47 = tpu.matmul %44, %46, %cst_28 {dimension_numbers = #tpu.dot_dimension_numbers<[1], [1], [2], [2], [0, 0, 0, 2, 1, 2], [0], [0]>} : vector<4x8x16xbf16>, vector<4x8x32xbf16>, vector<4x16x32xf32> -> vector<4x16x32xf32>
    %cst_29 = arith.constant 1.000000e+00 : bf16
    "tpu.trace_stop"() : () -> ()
    %48 = vector.broadcast %cst_29 : bf16 to vector<4x8x1xbf16>
    %49 = tpu.concatenate %44, %48 in 2 : vector<4x8x16xbf16>, vector<4x8x1xbf16> -> vector<4x8x17xbf16>
    "tpu.trace_start"() <{level = 10 : i32, message = "gnm,gmk->gnk"}> : () -> ()
    %cst_30 = arith.constant dense<0.000000e+00> : vector<4x8x17xf32>
    %50 = tpu.matmul %1, %49, %cst_30 {dimension_numbers = #tpu.dot_dimension_numbers<[2], [1], [1], [2], [0, 0, 0, 1, 1, 2], [0], [0]>} : vector<4x8x8xbf16>, vector<4x8x17xbf16>, vector<4x8x17xf32> -> vector<4x8x17xf32>
    "tpu.trace_stop"() : () -> ()
    %51 = vector.extract_strided_slice %50 {offsets = [0, 0, 0], sizes = [4, 8, 16], strides = [1, 1, 1]} : vector<4x8x17xf32> to vector<4x8x16xf32>
    %52 = vector.extract_strided_slice %50 {offsets = [0, 0, 16], sizes = [4, 8, 1], strides = [1, 1, 1]} : vector<4x8x17xf32> to vector<4x8x1xf32>
    %53 = arith.truncf %51 : vector<4x8x16xf32> to vector<4x8x16xbf16>
    "tpu.trace_start"() <{level = 10 : i32, message = "gnk,gnj->gkj"}> : () -> ()
    %cst_31 = arith.constant dense<0.000000e+00> : vector<4x16x16xf32>
    %54 = tpu.matmul %44, %53, %cst_31 {dimension_numbers = #tpu.dot_dimension_numbers<[1], [1], [2], [2], [0, 0, 0, 2, 1, 2], [0], [0]>} : vector<4x8x16xbf16>, vector<4x8x16xbf16>, vector<4x16x16xf32> -> vector<4x16x16xf32>
    "tpu.trace_stop"() : () -> ()
    %55 = tpu.iota {dimensions = array<i32: 1>} : vector<1x16x16xi32>
    %56 = tpu.iota {dimensions = array<i32: 2>} : vector<1x16x16xi32>
    %57 = arith.cmpi eq, %55, %56 : vector<1x16x16xi32>
    %cst_32 = arith.constant 0.000000e+00 : f32
    %58 = vector.shape_cast %57 : vector<1x16x16xi1> to vector<1x16x16xi1>
    %59 = vector.broadcast %58 : vector<1x16x16xi1> to vector<4x16x16xi1>
    %60 = vector.broadcast %cst_32 : f32 to vector<4x16x16xf32>
    %61 = arith.select %59, %54, %60 : vector<4x16x16xi1>, vector<4x16x16xf32>
    %cst_33 = arith.constant dense<0.000000e+00> : vector<4x16xf32>
    %62 = vector.multi_reduction <add>, %61, %cst_33 [2] : vector<4x16x16xf32> to vector<4x16xf32>
    %63 = vector.shape_cast %62 : vector<4x16xf32> to vector<4x16x1xf32>
    %cst_34 = arith.constant dense<0.000000e+00> : vector<4x1xf32>
    %64 = vector.multi_reduction <add>, %63, %cst_34 [1] : vector<4x16x1xf32> to vector<4x1xf32>
    %65 = vector.shape_cast %64 : vector<4x1xf32> to vector<4x1x1xf32>
    %66 = vector.broadcast %52 : vector<4x8x1xf32> to vector<4x8x16xf32>
    %67 = arith.mulf %66, %43 : vector<4x8x16xf32>
    %68 = arith.mulf %67, %43 : vector<4x8x16xf32>
    %cst_35 = arith.constant dense<0.000000e+00> : vector<4x8xf32>
    %69 = vector.multi_reduction <add>, %68, %cst_35 [2] : vector<4x8x16xf32> to vector<4x8xf32>
    %70 = vector.shape_cast %69 : vector<4x8xf32> to vector<4x8x1xf32>
    %cst_36 = arith.constant dense<0.000000e+00> : vector<4x1xf32>
    %71 = vector.multi_reduction <add>, %70, %cst_36 [1] : vector<4x8x1xf32> to vector<4x1xf32>
    %72 = vector.shape_cast %71 : vector<4x1xf32> to vector<4x1x1xf32>
    %73 = tpu.reciprocal %72 {approx = true} : vector<4x1x1xf32> -> vector<4x1x1xf32>
    %74 = arith.mulf %65, %73 : vector<4x1x1xf32>
    %cst_37 = arith.constant 0.000000e+00 : f32
    %75 = vector.broadcast %cst_37 : f32 to vector<4x1x1xf32>
    %76 = arith.subf %75, %74 : vector<4x1x1xf32>
    "tpu.trace_start"() <{level = 10 : i32, message = "gnk,gnj->gkj"}> : () -> ()
    %cst_38 = arith.constant dense<0.000000e+00> : vector<4x16x16xf32>
    %77 = tpu.matmul %44, %44, %cst_38 {dimension_numbers = #tpu.dot_dimension_numbers<[1], [1], [2], [2], [0, 0, 0, 2, 1, 2], [0], [0]>} : vector<4x8x16xbf16>, vector<4x8x16xbf16>, vector<4x16x16xf32> -> vector<4x16x16xf32>
    "tpu.trace_stop"() : () -> ()
    %78 = arith.mulf %77, %77 : vector<4x16x16xf32>
    %cst_39 = arith.constant dense<0.000000e+00> : vector<4x16xf32>
    %79 = vector.multi_reduction <add>, %78, %cst_39 [2] : vector<4x16x16xf32> to vector<4x16xf32>
    %80 = vector.shape_cast %79 : vector<4x16xf32> to vector<4x16x1xf32>
    %cst_40 = arith.constant dense<0.000000e+00> : vector<4x1xf32>
    %81 = vector.multi_reduction <add>, %80, %cst_40 [1] : vector<4x16x1xf32> to vector<4x1xf32>
    %82 = vector.shape_cast %81 : vector<4x1xf32> to vector<4x1x1xf32>
    %83 = math.rsqrt %82 : vector<4x1x1xf32>
    %84 = vector.broadcast %83 : vector<4x1x1xf32> to vector<4x16x16xf32>
    %85 = arith.mulf %77, %84 : vector<4x16x16xf32>
    %cst_41 = arith.constant 2.500000e-01 : f32
    %cst_42 = arith.constant 0.000000e+00 : f32
    %86 = vector.broadcast %cst_41 : f32 to vector<1x16x16xf32>
    %87 = vector.broadcast %cst_42 : f32 to vector<1x16x16xf32>
    %88 = arith.select %57, %86, %87 : vector<1x16x16xi1>, vector<1x16x16xf32>
    %89 = vector.broadcast %88 : vector<1x16x16xf32> to vector<4x16x16xf32>
    %90 = arith.subf %85, %89 : vector<4x16x16xf32>
    %91 = arith.mulf %90, %90 : vector<4x16x16xf32>
    %cst_43 = arith.constant dense<0.000000e+00> : vector<4x16xf32>
    %92 = vector.multi_reduction <add>, %91, %cst_43 [2] : vector<4x16x16xf32> to vector<4x16xf32>
    %93 = vector.shape_cast %92 : vector<4x16xf32> to vector<4x16x1xf32>
    %cst_44 = arith.constant dense<0.000000e+00> : vector<4x1xf32>
    %94 = vector.multi_reduction <add>, %93, %cst_44 [1] : vector<4x16x1xf32> to vector<4x1xf32>
    %95 = vector.shape_cast %94 : vector<4x1xf32> to vector<4x1x1xf32>
    %96 = math.sqrt %95 : vector<4x1x1xf32>
    %cst_45 = arith.constant 0.000000e+00 : f32
    %97 = vector.shape_cast %57 : vector<1x16x16xi1> to vector<1x16x16xi1>
    %98 = vector.broadcast %97 : vector<1x16x16xi1> to vector<4x16x16xi1>
    %99 = vector.broadcast %cst_45 : f32 to vector<4x16x16xf32>
    %100 = arith.select %98, %99, %54 : vector<4x16x16xi1>, vector<4x16x16xf32>
    %cst_46 = arith.constant dense<0.000000e+00> : vector<4x16xf32>
    %101 = vector.multi_reduction <add>, %100, %cst_46 [2] : vector<4x16x16xf32> to vector<4x16xf32>
    %102 = vector.shape_cast %101 : vector<4x16xf32> to vector<4x16x1xf32>
    %103 = math.sqrt %102 : vector<4x16x1xf32>
    %cst_47 = arith.constant 1.000000e-15 : f32
    %104 = vector.broadcast %cst_47 : f32 to vector<4x16x1xf32>
    %105 = arith.addf %103, %104 : vector<4x16x1xf32>
    %106 = tpu.reciprocal %105 {approx = true} : vector<4x16x1xf32> -> vector<4x16x1xf32>
    %107 = vector.broadcast %106 : vector<4x16x1xf32> to vector<4x16x32xf32>
    %108 = arith.mulf %107, %47 : vector<4x16x32xf32>
    "tpu.trace_start"() <{level = 10 : i32, message = "gkj,gjh->gkh"}> : () -> ()
    %cst_48 = arith.constant dense<0.000000e+00> : vector<4x16x32xf32>
    %109 = tpu.matmul %100, %108, %cst_48 {dimension_numbers = #tpu.dot_dimension_numbers<[2], [1], [1], [2], [0, 0, 0, 1, 1, 2], [0], [0]>} : vector<4x16x16xf32>, vector<4x16x32xf32>, vector<4x16x32xf32> -> vector<4x16x32xf32>
    "tpu.trace_stop"() : () -> ()
    %110 = vector.broadcast %106 : vector<4x16x1xf32> to vector<4x16x32xf32>
    %111 = arith.mulf %110, %109 : vector<4x16x32xf32>
    %112 = vector.shape_cast %111 : vector<4x16x32xf32> to vector<64x32xf32>
    %c0_49 = arith.constant 0 : index
    %c0_50 = arith.constant 0 : index
    %113 = vector.load %arg11[%c0_49, %c0_50] : memref<32x32xf32, #tpu.memory_space<vmem>>, vector<32x32xf32>
    %cst_51 = arith.constant dense<0.000000e+00> : vector<64x32xf32>
    %114 = tpu.matmul %112, %113, %cst_51 {dimension_numbers = #tpu.dot_dimension_numbers<[1], [0], [0], [1], [0, 0, 1, 1], [], []>} : vector<64x32xf32>, vector<32x32xf32>, vector<64x32xf32> -> vector<64x32xf32>
    %115 = vector.shape_cast %47 : vector<4x16x32xf32> to vector<64x32xf32>
    %c0_52 = arith.constant 0 : index
    %c0_53 = arith.constant 0 : index
    %116 = vector.load %arg12[%c0_52, %c0_53] : memref<32x32xf32, #tpu.memory_space<vmem>>, vector<32x32xf32>
    %cst_54 = arith.constant dense<0.000000e+00> : vector<64x32xf32>
    %117 = tpu.matmul %115, %116, %cst_54 {dimension_numbers = #tpu.dot_dimension_numbers<[1], [0], [0], [1], [0, 0, 1, 1], [], []>} : vector<64x32xf32>, vector<32x32xf32>, vector<64x32xf32> -> vector<64x32xf32>
    %118 = arith.addf %114, %117 : vector<64x32xf32>
    %c0_55 = arith.constant 0 : index
    %c0_56 = arith.constant 0 : index
    %119 = vector.load %arg13[%c0_55, %c0_56] : memref<1x32xf32, #tpu.memory_space<vmem>>, vector<1x32xf32>
    %120 = vector.broadcast %119 : vector<1x32xf32> to vector<64x32xf32>
    %121 = arith.addf %118, %120 : vector<64x32xf32>
    %122 = vector.shape_cast %121 : vector<64x32xf32> to vector<4x16x32xf32>
    %cst_57 = arith.constant dense<0.000000e+00> : vector<4x32xf32>
    %123 = vector.multi_reduction <add>, %122, %cst_57 [1] : vector<4x16x32xf32> to vector<4x32xf32>
    %c0_58 = arith.constant 0 : index
    %c0_59 = arith.constant 0 : index
    %124 = vector.load %arg14[%c0_58, %c0_59] : memref<32x32xf32, #tpu.memory_space<vmem>>, vector<32x32xf32>
    %cst_60 = arith.constant dense<0.000000e+00> : vector<4x32xf32>
    %125 = tpu.matmul %123, %124, %cst_60 {dimension_numbers = #tpu.dot_dimension_numbers<[1], [0], [0], [1], [0, 0, 1, 1], [], []>} : vector<4x32xf32>, vector<32x32xf32>, vector<4x32xf32> -> vector<4x32xf32>
    %c0_61 = arith.constant 0 : index
    %c0_62 = arith.constant 0 : index
    %126 = vector.load %arg15[%c0_61, %c0_62] : memref<1x32xf32, #tpu.memory_space<vmem>>, vector<1x32xf32>
    %127 = vector.broadcast %126 : vector<1x32xf32> to vector<4x32xf32>
    %128 = arith.addf %125, %127 : vector<4x32xf32>
    %cst_63 = arith.constant 0.000000e+00 : f32
    %129 = vector.broadcast %cst_63 : f32 to vector<4x32xf32>
    %130 = arith.maximumf %128, %129 : vector<4x32xf32>
    %c0_64 = arith.constant 0 : index
    %c0_65 = arith.constant 0 : index
    %131 = vector.load %arg16[%c0_64, %c0_65] : memref<32x4xf32, #tpu.memory_space<vmem>>, vector<32x4xf32>
    %cst_66 = arith.constant dense<0.000000e+00> : vector<4x4xf32>
    %132 = tpu.matmul %130, %131, %cst_66 {dimension_numbers = #tpu.dot_dimension_numbers<[1], [0], [0], [1], [0, 0, 1, 1], [], []>} : vector<4x32xf32>, vector<32x4xf32>, vector<4x4xf32> -> vector<4x4xf32>
    %c0_67 = arith.constant 0 : index
    %c0_68 = arith.constant 0 : index
    %133 = vector.load %arg17[%c0_67, %c0_68] : memref<1x4xf32, #tpu.memory_space<vmem>>, vector<1x4xf32>
    %134 = vector.broadcast %133 : vector<1x4xf32> to vector<4x4xf32>
    %135 = arith.addf %132, %134 : vector<4x4xf32>
    %cst_69 = arith.constant dense<0xFF800000> : vector<4xf32>
    %136 = vector.multi_reduction <maximumf>, %135, %cst_69 [1] : vector<4x4xf32> to vector<4xf32>
    %137 = vector.shape_cast %136 : vector<4xf32> to vector<4x1xf32>
    %138 = vector.broadcast %137 : vector<4x1xf32> to vector<4x4xf32>
    %139 = arith.subf %135, %138 : vector<4x4xf32>
    %140 = math.exp %139 : vector<4x4xf32>
    %cst_70 = arith.constant dense<0.000000e+00> : vector<4xf32>
    %141 = vector.multi_reduction <add>, %140, %cst_70 [1] : vector<4x4xf32> to vector<4xf32>
    %142 = vector.shape_cast %141 : vector<4xf32> to vector<4x1xf32>
    %143 = math.log %142 : vector<4x1xf32>
    %144 = vector.broadcast %143 : vector<4x1xf32> to vector<4x4xf32>
    %145 = arith.subf %139, %144 : vector<4x4xf32>
    %146 = vector.shape_cast %76 : vector<4x1x1xf32> to vector<4x1xf32>
    %147 = vector.shape_cast %96 : vector<4x1x1xf32> to vector<4x1xf32>
    %148 = tpu.concatenate %145, %146, %147 in 1 : vector<4x4xf32>, vector<4x1xf32>, vector<4x1xf32> -> vector<4x6xf32>
    %cst_71 = arith.constant 0.000000e+00 : f32
    %149 = vector.broadcast %cst_71 : f32 to vector<4x122xf32>
    %150 = tpu.concatenate %148, %149 in 1 : vector<4x6xf32>, vector<4x122xf32> -> vector<4x128xf32>
    %151 = vector.shape_cast %150 : vector<4x128xf32> to vector<1x4x128xf32>
    %c0_72 = arith.constant 0 : index
    %c0_73 = arith.constant 0 : index
    %c0_74 = arith.constant 0 : index
    %152 = vector.load %arg18[%c0_72, %c0_73, %c0_74] : memref<1x4x128xf32, #tpu.memory_space<vmem>>, vector<1x4x128xf32>
    tpu.vector_store %arg18[%c0_72, %c0_73, %c0_74], %151 {strides = array<i32>} : memref<1x4x128xf32, #tpu.memory_space<vmem>>, vector<1x4x128xf32>,
    return
  }
  func.func @transform_0(%arg0: i32) -> (i32, i32, i32) {
    %c0_i32 = arith.constant 0 : i32
    %c0_i32_0 = arith.constant 0 : i32
    %c0_i32_1 = arith.constant 0 : i32
    return %arg0, %c0_i32, %c0_i32_0 : i32, i32, i32
  }
  func.func @transform_1(%arg0: i32) -> (i32, i32, i32) {
    %c0_i32 = arith.constant 0 : i32
    %c0_i32_0 = arith.constant 0 : i32
    %c0_i32_1 = arith.constant 0 : i32
    return %arg0, %c0_i32, %c0_i32_0 : i32, i32, i32
  }
  func.func @transform_2(%arg0: i32) -> (i32, i32, i32) {
    %c0_i32 = arith.constant 0 : i32
    %c0_i32_0 = arith.constant 0 : i32
    %c0_i32_1 = arith.constant 0 : i32
    return %arg0, %c0_i32, %c0_i32_0 : i32, i32, i32
  }
  func.func @transform_3(%arg0: i32) -> (i32, i32) {
    %c0_i32 = arith.constant 0 : i32
    %c0_i32_0 = arith.constant 0 : i32
    %c0_i32_1 = arith.constant 0 : i32
    return %c0_i32, %c0_i32_0 : i32, i32
  }
  func.func @transform_4(%arg0: i32) -> (i32, i32) {
    %c0_i32 = arith.constant 0 : i32
    %c0_i32_0 = arith.constant 0 : i32
    %c0_i32_1 = arith.constant 0 : i32
    return %c0_i32, %c0_i32_0 : i32, i32
  }
  func.func @transform_5(%arg0: i32) -> (i32, i32) {
    %c0_i32 = arith.constant 0 : i32
    %c0_i32_0 = arith.constant 0 : i32
    %c0_i32_1 = arith.constant 0 : i32
    return %c0_i32, %c0_i32_0 : i32, i32
  }
  func.func @transform_6(%arg0: i32) -> (i32, i32) {
    %c0_i32 = arith.constant 0 : i32
    %c0_i32_0 = arith.constant 0 : i32
    %c0_i32_1 = arith.constant 0 : i32
    return %c0_i32, %c0_i32_0 : i32, i32
  }
  func.func @transform_7(%arg0: i32) -> (i32, i32) {
    %c0_i32 = arith.constant 0 : i32
    %c0_i32_0 = arith.constant 0 : i32
    %c0_i32_1 = arith.constant 0 : i32
    return %c0_i32, %c0_i32_0 : i32, i32
  }
  func.func @transform_8(%arg0: i32) -> (i32, i32) {
    %c0_i32 = arith.constant 0 : i32
    %c0_i32_0 = arith.constant 0 : i32
    %c0_i32_1 = arith.constant 0 : i32
    return %c0_i32, %c0_i32_0 : i32, i32
  }
  func.func @transform_9(%arg0: i32) -> (i32, i32) {
    %c0_i32 = arith.constant 0 : i32
    %c0_i32_0 = arith.constant 0 : i32
    %c0_i32_1 = arith.constant 0 : i32
    return %c0_i32, %c0_i32_0 : i32, i32
  }
  func.func @transform_10(%arg0: i32) -> (i32, i32) {
    %c0_i32 = arith.constant 0 : i32
    %c0_i32_0 = arith.constant 0 : i32
    %c0_i32_1 = arith.constant 0 : i32
    return %c0_i32, %c0_i32_0 : i32, i32
  }
  func.func @transform_11(%arg0: i32) -> (i32, i32) {
    %c0_i32 = arith.constant 0 : i32
    %c0_i32_0 = arith.constant 0 : i32
    %c0_i32_1 = arith.constant 0 : i32
    return %c0_i32, %c0_i32_0 : i32, i32
  }
  func.func @transform_12(%arg0: i32) -> (i32, i32) {
    %c0_i32 = arith.constant 0 : i32
    %c0_i32_0 = arith.constant 0 : i32
    %c0_i32_1 = arith.constant 0 : i32
    return %c0_i32, %c0_i32_0 : i32, i32
  }
  func.func @transform_13(%arg0: i32) -> (i32, i32) {
    %c0_i32 = arith.constant 0 : i32
    %c0_i32_0 = arith.constant 0 : i32
    %c0_i32_1 = arith.constant 0 : i32
    return %c0_i32, %c0_i32_0 : i32, i32
  }
  func.func @transform_14(%arg0: i32) -> (i32, i32) {
    %c0_i32 = arith.constant 0 : i32
    %c0_i32_0 = arith.constant 0 : i32
    %c0_i32_1 = arith.constant 0 : i32
    return %c0_i32, %c0_i32_0 : i32, i32
  }
  func.func @transform_15(%arg0: i32) -> (i32, i32) {
    %c0_i32 = arith.constant 0 : i32
    %c0_i32_0 = arith.constant 0 : i32
    %c0_i32_1 = arith.constant 0 : i32
    return %c0_i32, %c0_i32_0 : i32, i32
  }
  func.func @transform_16(%arg0: i32) -> (i32, i32) {
    %c0_i32 = arith.constant 0 : i32
    %c0_i32_0 = arith.constant 0 : i32
    %c0_i32_1 = arith.constant 0 : i32
    return %c0_i32, %c0_i32_0 : i32, i32
  }
  func.func @transform_17(%arg0: i32) -> (i32, i32, i32) {
    %c0_i32 = arith.constant 0 : i32
    %c0_i32_0 = arith.constant 0 : i32
    %c0_i32_1 = arith.constant 0 : i32
    return %arg0, %c0_i32, %c0_i32_0 : i32, i32, i32
  }
}

</mosaic_0001>

<bundles_post_ra>
// kernel: tpu_custom_call.1
= control target key start
LH: loop header
LB: loop body
LE: loop exit
PB: predicated region body
PF: predicated region fallthrough
CT: control target
= control target key end

     0   :  { %s3681_s0 = inlined_call_operand.vmem [shape: f32[8,8,4], index: 0, kind: input, shape index: {}]   ;;  %s3682_s1 = inlined_call_operand.vmem [shape: bf16[8,8,8], index: 1, kind: input, shape index: {}]   ;;  %s3683_s2 = inlined_call_operand.vmem [shape: s32[8,1,1], index: 2, kind: input, shape index: {}]   ;;  %s3684_s3 = inlined_call_operand.vmem [shape: f32[4,32], index: 3, kind: input, shape index: {}]   ;;  %s3685_s4 = inlined_call_operand.vmem [shape: f32[1,32], index: 4, kind: input, shape index: {}]   ;;  %s3686_s5 = inlined_call_operand.vmem [shape: f32[32,32], index: 5, kind: input, shape index: {}]   ;;  %s3687_s6 = inlined_call_operand.vmem [shape: f32[32,32], index: 6, kind: input, shape index: {}]   ;;  %s3688_s7 = inlined_call_operand.vmem [shape: f32[1,32], index: 7, kind: input, shape index: {}]   ;;  %s3689_s8 = inlined_call_operand.vmem [shape: f32[32,16], index: 8, kind: input, shape index: {}]   ;;  %s3690_s9 = inlined_call_operand.vmem [shape: f32[1,16], index: 9, kind: input, shape index: {}]   ;;  %s3691_s10 = inlined_call_operand.vmem [shape: f32[32,32], index: 10, kind: input, shape index: {}]   ;;  %s3692_s11 = inlined_call_operand.hbm [shape: f32[32,32], index: 11, kind: input, shape index: {}]   ;;  %s3693_s12 = inlined_call_operand.vmem [shape: f32[1,32], index: 12, kind: input, shape index: {}]   ;;  %s3694_s13 = inlined_call_operand.hbm [shape: f32[32,32], index: 13, kind: input, shape index: {}]   ;;  %s3695_s14 = inlined_call_operand.vmem [shape: f32[1,32], index: 14, kind: input, shape index: {}]   ;;  %s3696_s15 = inlined_call_operand.vmem [shape: f32[32,4], index: 15, kind: input, shape index: {}]   ;;  %s3697_s16 = inlined_call_operand.vmem [shape: f32[1,4], index: 16, kind: input, shape index: {}]   ;;  %s3698_s17 = inlined_call_operand.hbm [shape: f32[2,4,128], index: 17, kind: output, shape index: {}]  }
   0x1   :  { %3705 = sst [smem:[#allocation17_spill]] %s3681_s0 }
   0x2   :  { %3706 = sst [smem:[#allocation18_spill]] %s3682_s1 }
   0x3   :  { %3707 = sst [smem:[#allocation19_spill]] %s3683_s2 }
   0x4   :  { %22 = vsyncpa [#allocation3], 0 }
   0x5   :  { %23 = vsyncpa [#allocation6], 0 }
   0x6   :  { %24 = vsyncpa [#allocation4], 0 }
   0x7   :  { %26 = vsyncpa [#allocation4 + $0x1], 0  ;;  %s2903_s24 = smov 0   ;;  %s2905_s25 = smov 0  }
   0x8   :  { %s2907_s26 = smov 0   ;;  %s2909_s27 = smov 0  }
   0x9 LB: > { %3708 = sst [smem:[#allocation11_spill]] %s2792_s24  ;;  %s2924_s28 = sadd.s32 4294967295, %s2804_s27   ;;  %s2804_s27 = sphi %s2909_s27, %s3727_s27   ;;  %s2800_s26 = sphi %s2907_s26, %s3729_s26   ;;  %s2796_s25 = sphi %s2905_s25, %s3731_s25   ;;  %s2792_s24 = sphi %s2903_s24, %s3730_s24  }
   0xa   : > { %3709 = sst [smem:[#allocation12_spill]] %s2800_s26  ;;  %s2420_s29 = sadd.s32 4294967294, %s2804_s27  }
   0xb   : > { %3710 = sst [smem:[#allocation13_spill]] %s2804_s27  ;;  %s2928_s0 = sadd.s32 1, %s2804_s27  }
   0xc   : > { %3711 = sst [smem:[#allocation14_spill]] %s2928_s0  ;;  %s411_s30 = sadd.s32 1, %s2800_s26 }
   0xd   : > { %s408_s18 = ssub.s32 %s2804_s27, %s2928_s0  ;;  %p421_p0 = scmp.ne.s32.totalorder %s2800_s26, %s2796_s25 }
   0xe   : > { %p409_p1 = scmp.eq.s32.totalorder %s408_s18, 0  ;;  %p422_p2 = scmp.eq.s32.totalorder %s2924_s28, 1 }
   0xf   : > { %p427_p3 = scmp.ne.s32.totalorder %s2796_s25, %s2792_s24  ;;  %p428_p4 = scmp.eq.s32.totalorder %s2420_s29, 1 }
  0x10   : > { %s2939_s19 = scalar_select %p409_p1, %s2800_s26, %s411_s30  }
  0x11   : > { %p2941_p5 = por %p422_p2, %p421_p0  ;;  %p2945_p6 = por %p428_p4, %p427_p3 }
  0x12   : > { %3712 = sst [smem:[#allocation15_spill]] %s2939_s19  ;;  %p2421_p7 = scmp.ge.s32.totalorder %s2804_s27, 1 }
  0x13   : > { %s3714_s20 = scalar_select %p2945_p6, 1, 0 }
  0x14   : > { %p435_p8 = scmp.lt.s32.totalorder %s2804_s27, 3  ;;  %p2530_p9 = scmp.eq.s32.totalorder %s2924_s28, 0 }
  0x15   : > { %3715 = sst [smem:[#allocation16_spill]] %s3714_s20  ;;  %s470_s29 = sshll.u32 %s3692_s11, 4  ;;  %s471_s29 = int_to_ptr.hbm [resolvable:$true] %s470_s29 }
  0x16   : > { %p2952_p10 = pnand %p2421_p7, %p435_p8  ;;  %s2806_s30 = smov [#allocation2]  }
  0x17   : > { %s472_s18 = sshll.u32 %s2806_s30, 4  ;;  %s487_s0 = sshll.u32 %s3694_s13, 4  ;;  %s473_s18 = int_to_ptr.vmem [resolvable:$true] %s472_s18  ;;  %s488_s0 = int_to_ptr.hbm [resolvable:$true] %s487_s0 }
  0x18   : > { %p2519_p11 = pneg %p2952_p10  ;;  %s2807_s20 = smov 128  }
  0x19   : > { %s2808_s24 = smov 8   ;;  %s2809_s27 = smov [#allocation5]  }
  0x1a   : > { %p2520_p12 = pnand %p2530_p9, %p2519_p11  ;;  %s489_s22 = sshll.u32 %s2809_s27, 4  ;;  %s490_s22 = int_to_ptr.vmem [resolvable:$true] %s489_s22 }
  0x1b   : > { %540 = sbr.rel (%p2952_p10) target bundleno = 2369 (0x941), region = 88 }
  0x1c   : > { %2522 = dma.hbm_to_vmem [thread:$0]  (!%p2520_p12), %s471_s29, 512, %s473_s18, [#allocation3], %s2807_s20, %s2807_s20, %s2808_s24  }
  0x1d   : > { %2525 = dma.hbm_to_vmem [thread:$0]  (!%p2520_p12), %s488_s0, 512, %s490_s22, [#allocation6], %s2807_s20, %s2807_s20, %s2808_s24  }
  0x20   : > { %2779 = dma.done.wait (%p2530_p9), [#allocation3], 512  }
  0x21   : > { %2781 = vsyncadd (%p2530_p9), [#allocation3], 4294966784 }
  0x22   : > { %2783 = dma.done.wait (%p2530_p9), [#allocation6], 512  }
  0x23   : > { %2785 = vsyncadd (%p2530_p9), [#allocation6], 4294966784  ;;  %s2977_s26 = sshll.u32 %s2924_s28, 2  ;;  %vm674_vm0 = vcmask 1043456   ;;  %s3717_s20 = sld [smem:[#allocation17_spill]]  ;;  %vm661_vm1 = vcmask 31744  }
  0x24   : > { %p608_p13 = scmp.lt.s32.totalorder %s2977_s26, 7  ;;  %v656_v0 = vld [vmem:[%s3684_s3] sm:$0xf]  ;;  %s3718_s0 = sld [smem:[#allocation18_spill]]  ;;  %vm711_vm2 = vcmask 64512   ;;  %v795_v14 = vld [vmem:[%s3687_s6 + $0x18] sm:$0xff] }
  0x25   : > { %2438 = vmatpush.msk.msra.mxu3 %vm674_vm0, %v656_v0  ;;  %v2588_v5 = vld [vmem:[%s3685_s4] ss:$0 sm:$0xff]  ;;  %v794_v17 = vld [vmem:[%s3687_s6 + $0x10] sm:$0xff]  ;;  %v793_v20 = vld [vmem:[%s3687_s6 + $0x8] sm:$0xff]  ;;  %vm796_vm3 = vcmask 261120   ;;  %vm936_vm4 = vcmask 130048  }
  0x26   : > { %s2981_s24 = scalar_select %p608_p13, %s2977_s26, 7  ;;  %v792_v22 = vld [vmem:[%s3687_s6] sm:$0xff]  ;;  %v791_v27 = vld [vmem:[%s3686_s5 + $0x18] sm:$0xff]  ;;  %v790_v28 = vld [vmem:[%s3686_s5 + $0x10] sm:$0xff] }
  0x27   : > { %v789_v30 = vld [vmem:[%s3686_s5 + $0x8] sm:$0xff]  ;;  %v788_v33 = vld [vmem:[%s3686_s5] sm:$0xff]  ;;  %v890_v39 = vld [vmem:[%s3689_s8 + $0x18] sm:$0xff]  ;;  %s3719_s2 = sld [smem:[#allocation19_spill]]  ;;  %s604_s22 = sand.u32 1, %s2796_s25  }
  0x28   : > { %s2430_s27 = sshll.u32 %s2981_s24, 3  ;;  %s2432_s18 = sshll.u32 %s2981_s24, 2  ;;  %919 = vmatpush.msra.mxu0 %v890_v39  ;;  %v889_v43 = vld [vmem:[%s3689_s8 + $0x10] sm:$0xff]  ;;  %v888_v44 = vld [vmem:[%s3689_s8 + $0x8] sm:$0xff]  ;;  %v887_v45 = vld [vmem:[%s3689_s8] sm:$0xff] }
  0x29   : > { %s611_s21 = scalar_lea.vmem %s3717_s20, %s2430_s27  ;;  %v2589_v46 = vld [vmem:[%s3688_s7] ss:$0 sm:$0xff]  ;;  %s2313_s20 = scalar_lea.hbm %s3698_s17, %s2977_s26 }
  0x2a   : > { %v626_v1 = vld [vmem:[%s611_s21] sm:$0xff]  ;;  %v627_v2 = vld [vmem:[%s611_s21 + $0x8] sm:$0xff]  ;;  %v628_v3 = vld [vmem:[%s611_s21 + $0x10] sm:$0xff]  ;;  %s3002_s19 = scalar_lea.vmem %s3718_s0, %s2432_s18  ;;  %920 = vmatpush.msra.mxu0 %v889_v43  ;;  %s2317_s23 = sshll.u32 %s2313_s20, 4  ;;  %s2318_s23 = int_to_ptr.hbm [resolvable:$true] %s2317_s23 }
  0x2b   : > { %2439 = vmatmul.msk.f32.vlgmr.msra.gmra.mxu3 %vm661_vm1, %v626_v1  ;;  %v629_v4 = vld [vmem:[%s611_s21 + $0x18] sm:$0xff]  ;;  %v3006_v10 = vld [vmem:[%s3002_s19] sm:$0xf]  ;;  %v3015_v16 = vld [vmem:[%s3002_s19 + $0x4] sm:$0xf]  ;;  %s2303_s29 = scalar_lea.sflag [#allocation4], %s604_s22 }
  0x2c   : > { %v3030_v24 = vld [vmem:[%s3002_s19 + $0x8] sm:$0xf]  ;;  %v3045_v32 = vld [vmem:[%s3002_s19 + $0xc] sm:$0xf]  ;;  %921 = vmatpush.msra.mxu0 %v888_v44  ;;  %s2748_s28 = sshra.s32 %s2318_s23, 4  ;;  %s2749_s28 = int_to_ptr.hbm [resolvable:$true] %s2748_s28 }
  0x2d   : > { %s3094_s27 = scalar_lea.vmem %s3719_s2, %s2981_s24  ;;  %s2750_s30 = scalar_lea.hbm %s2749_s28, 4 }
  0x2e   : > { %922 = vmatpush.msra.mxu0 %v887_v45  ;;  %v2592_v43 = vld [vmem:[%s3094_s27] ss:$0 sm:$0xff]  ;;  %v2593_v44 = vld [vmem:[%s3094_s27 + $0x2] ss:$0 sm:$0xff]  ;;  %v2811_v45 = vmov 0.0   ;;  %p2751_p0 = scmp.ne.s32.totalorder %s2749_s28, %s2750_s30  ;;  %p2755_p3 = scmp.lt.s32.totalorder %s2749_s28, %s3698_s17 }
  0x30   : > { %p2752_p1 = pnand %p2751_p0, %p2941_p5 }
  0x32   : > { %p2753_p2 = pneg %p2752_p1 }
  0x33   : > { %2440 = vmatmul.msk.f32.gmra.mxu3 %vm661_vm1, %v627_v2 }
  0x3b   : > { %2441 = vmatmul.msk.f32.gmra.mxu3 %vm661_vm1, %v628_v3 }
  0x43   : > { %2442 = vmatmul.msk.f32.gmra.mxu3 %vm661_vm1, %v629_v4 }
  0xae   : > { %v695_v6 = vpop.f32.mrf.mxu3 }
  0xaf   : > { %v696_v7 = vadd.f32 %v2588_v5, %v695_v6 }
  0xb1   : > { %v707_v8 = vpack.c.bf16 %v696_v7, %v696_v7 }
  0xb3   : > { %v716_v9 = vsel %vm674_vm0, %v707_v8, 0  ;;  %v2590_v8 = vld [vmem:[%s3690_s9] ss:$0 sm:$0xff] }
  0xb4   : > { %725 = vmatpush.bf16.msra.mxu1 %v716_v9 }
  0xb6   : > { %v698_v11 = vpop.f32.mrf.mxu3 }
  0xb7   : > { %v699_v12 = vadd.f32 %v2588_v5, %v698_v11  ;;  %2443 = vmatmul.msk.bf16.vlgmr.msra.gmra.mxu1 %vm711_vm2, %v3006_v10 }
  0xb9   : > { %v708_v13 = vpack.c.bf16 %v699_v12, %v699_v12 }
  0xbb   : > { %v735_v15 = vsel %vm674_vm0, %v708_v13, 0 }
  0xbc   : > { %744 = vmatpush.bf16.msra.mxu2 %v735_v15 }
  0xbe   : > { %v701_v18 = vpop.f32.mrf.mxu3 }
  0xbf   : > { %v702_v19 = vadd.f32 %v2588_v5, %v701_v18  ;;  %2444 = vmatmul.msk.bf16.vlgmr.msra.gmra.mxu2 %vm711_vm2, %v3015_v16 }
  0xc0   : > { %821 = vmatpush.msrb.mxu2 %v795_v14 }
  0xc1   : > { %v709_v21 = vpack.c.bf16 %v702_v19, %v702_v19 }
  0xc2   : > { %822 = vmatpush.msrb.mxu2 %v794_v17 }
  0xc3   : > { %v754_v23 = vsel %vm674_vm0, %v709_v21, 0 }
  0xc4   : > { %823 = vmatpush.msrb.mxu2 %v793_v20  ;;  %763 = vmatpush.bf16.msrb.mxu3 %v754_v23 }
  0xc6   : > { %824 = vmatpush.msrb.mxu2 %v792_v22  ;;  %v704_v25 = vpop.f32.mrf.mxu3  ;;  %v2810_v22 = vmov 0  }
  0xc7   : > { %2445 = vmatmul.msk.bf16.vlgmr.msrb.gmra.mxu3 %vm711_vm2, %v3030_v24  ;;  %v705_v26 = vadd.f32 %v2588_v5, %v704_v25  ;;  %2581 = vset.pattern.permute.xlu1 %v2810_v22 }
  0xc8   : > { %862 = vmatpush.msra.mxu3 %v791_v27  ;;  %2574 = vset.pattern.permute.xlu2 %v2810_v22 }
  0xc9   : > { %v710_v29 = vpack.c.bf16 %v705_v26, %v705_v26  ;;  %2580 = vset.pattern.permute.xlu0 %v2810_v22 }
  0xca   : > { %863 = vmatpush.msra.mxu3 %v790_v28 }
  0xcb   : > { %v773_v31 = vsel %vm674_vm0, %v710_v29, 0 }
  0xcc   : > { %782 = vmatpush.bf16.msrb.mxu1 %v773_v31  ;;  %864 = vmatpush.msra.mxu3 %v789_v30 }
  0xce   : > { %865 = vmatpush.msra.mxu3 %v788_v33 }
  0xcf   : > { %2447 = vmatmul.msk.f32.vlgmr.msrb.gmra.mxu2 %vm796_vm3, %v696_v7  ;;  %2446 = vmatmul.msk.bf16.vlgmr.msrb.gmra.mxu1 %vm711_vm2, %v3045_v32 }
  0xd7   : > { %2448 = vmatmul.msk.f32.gmra.mxu2 %vm796_vm3, %v699_v12 }
  0xdf   : > { %2449 = vmatmul.msk.f32.gmra.mxu2 %vm796_vm3, %v702_v19 }
  0xe7   : > { %2450 = vmatmul.msk.f32.gmra.mxu2 %vm796_vm3, %v705_v26 }
 0x134   : > { %v727_v34 = vpop.f32.mrf.mxu1 }
 0x135   : > { %2451 = vmatmul.msk.f32.vlgmr.msra.gmra.mxu3 %vm796_vm3, %v727_v34 }
 0x13c   : > { %v729_v35 = vpop.f32.mrf.mxu1 }
 0x142   : > { %v746_v36 = vpop.f32.mrf.mxu2 }
 0x143   : > { %2452 = vmatmul.msk.f32.gmra.mxu3 %vm796_vm3, %v746_v36 }
 0x14a   : > { %v748_v37 = vpop.f32.mrf.mxu2  ;;  %v765_v38 = vpop.f32.mrf.mxu3 }
 0x14b   : > { %2453 = vmatmul.msk.f32.gmra.mxu3 %vm796_vm3, %v765_v38  ;;  %v638_v38 = vlaneseq }
 0x14c   : > { %v784_v40 = vpop.f32.mrf.mxu1 }
 0x152   : > { %v767_v41 = vpop.f32.mrf.mxu3  ;;  %v826_v47 = vpop.f32.mrf.mxu2 }
 0x153   : > { %2454 = vmatmul.msk.f32.gmra.mxu3 %vm796_vm3, %v784_v40  ;;  %v3100_v41 = vshrl.u32 %v638_v38, 7 }
 0x154   : > { %v786_v42 = vpop.f32.mrf.mxu1 }
 0x155   : > { %v2591_v42 = vld [vmem:[%s3094_s27 + $0x1] ss:$0 sm:$0xff]  ;;  %vm644_vm6 = vcmp.lt.s32.totalorder %v3100_v41, %v2592_v43  ;;  %vm646_vm7 = vcmp.lt.s32.totalorder %v3100_v41, %v2593_v44 }
 0x156   : > { %vm645_vm5 = vcmp.lt.s32.totalorder %v3100_v41, %v2591_v42 }
 0x15a   : > { %v829_v53 = vpop.f32.mrf.mxu2 }
 0x162   : > { %v832_v59 = vpop.f32.mrf.mxu2 }
 0x16a   : > { %v835_v1 = vpop.f32.mrf.mxu2 }
 0x1b8   : > { %v867_v48 = vpop.f32.mrf.mxu3 }
 0x1b9   : > { %v868_v49 = vadd.f32 %v867_v48, %v826_v47  ;;  %v2434_v47 = vsel %vm644_vm6, 1.0, %v2811_v45  ;;  %v2436_v48 = vsel %vm646_vm7, 1.0, %v2811_v45 }
 0x1bb   : > { %v883_v50 = vadd.f32 %v2589_v46, %v868_v49  ;;  %v2575_v49 = vpack.i.bf16 %v2434_v47, %v2436_v48 }
 0x1bd   : > { %v1009_v51 = vpack.c.bf16 %v883_v50, %v883_v50  ;;  %2455 = vmatmul.msk.f32.vlgmr.msra.gmra.mxu0 %vm796_vm3, %v883_v50  ;;  %v2594_v50 = vld [vmem:[%s3094_s27 + $0x3] ss:$0 sm:$0xff]  ;;  %s3628_s27 = sshll.u32 %s604_s22, 2 }
 0x1be   : > { %vm647_vm8 = vcmp.lt.s32.totalorder %v3100_v41, %v2594_v50  ;;  %s606_s21 = scalar_lea.vmem [#allocation7], %s3628_s27  ;;  %s2754_s27 = scalar_lea.hbm %s3698_s17, 8 }
 0x1bf   : > { %v1033_v52 = vsel %vm674_vm0, %v1009_v51, 0  ;;  %v2437_v51 = vsel %vm647_vm8, 1.0, %v2811_v45  ;;  %s2315_s26 = sshll.u32 %s606_s21, 4  ;;  %p2756_p4 = scmp.lt.s32.totalorder %s2754_s27, %s2750_s30  ;;  %s2316_s26 = int_to_ptr.vmem [resolvable:$true] %s2315_s26 }
 0x1c0   : > { %1042 = vmatpush.bf16.msra.mxu1 %v1033_v52 }
 0x1c1   : > { %p2757_p7 = por %p2756_p4, %p2755_p3 }
 0x1c3   : > { %p2758_p8 = pnand %p2757_p7, %p2753_p2 }
 0x1c6   : > { %v870_v54 = vpop.f32.mrf.mxu3 }
 0x1c7   : > { %v871_v55 = vadd.f32 %v870_v54, %v829_v53 }
 0x1c9   : > { %v884_v56 = vadd.f32 %v2589_v46, %v871_v55 }
 0x1cb   : > { %v1010_v57 = vpack.c.bf16 %v884_v56, %v884_v56  ;;  %2456 = vmatmul.msk.f32.gmra.mxu0 %vm796_vm3, %v884_v56 }
 0x1cd   : > { %v1069_v58 = vsel %vm674_vm0, %v1010_v57, 0 }
 0x1ce   : > { %v873_v60 = vpop.f32.mrf.mxu3  ;;  %1078 = vmatpush.bf16.msrb.mxu1 %v1069_v58 }
 0x1cf   : > { %v874_v61 = vadd.f32 %v873_v60, %v832_v59 }
 0x1d1   : > { %v885_v62 = vadd.f32 %v2589_v46, %v874_v61 }
 0x1d3   : > { %v1011_v63 = vpack.c.bf16 %v885_v62, %v885_v62  ;;  %2457 = vmatmul.msk.f32.gmra.mxu0 %vm796_vm3, %v885_v62 }
 0x1d5   : > { %v1105_v0 = vsel %vm674_vm0, %v1011_v63, 0 }
 0x1d6   : > { %v876_v2 = vpop.f32.mrf.mxu3  ;;  %1114 = vmatpush.bf16.msra.mxu2 %v1105_v0 }
 0x1d7   : > { %v877_v3 = vadd.f32 %v876_v2, %v835_v1 }
 0x1d9   : > { %v886_v4 = vadd.f32 %v2589_v46, %v877_v3  ;;  %v2435_v46 = vsel %vm645_vm5, 1.0, %v2811_v45 }
 0x1db   : > { %v1012_v5 = vpack.c.bf16 %v886_v4, %v886_v4  ;;  %2458 = vmatmul.msk.f32.gmra.mxu0 %vm796_vm3, %v886_v4 }
 0x1dd   : > { %v1141_v6 = vsel %vm674_vm0, %v1012_v5, 0 }
 0x1de   : > { %1150 = vmatpush.bf16.msrb.mxu3 %v1141_v6 }
 0x23a   : > { %v924_v7 = vpop.f32.mrf.mxu0 }
 0x23b   : > { %v925_v17 = vadd.f32 %v2590_v8, %v924_v7 }
 0x23d   : > { %v937_v20 = vsel %vm936_vm4, %v925_v17, -inf }
 0x248   : > { %v927_v9 = vpop.f32.mrf.mxu0 }
 0x249   : > { %v928_v11 = vadd.f32 %v2590_v8, %v927_v9 }
 0x24b   : > { %v940_v12 = vsel %vm936_vm4, %v928_v11, -inf }
 0x24c   : > { %941 = vmax.xlane.f32.xlu1 %v940_v12 }
 0x250   : > { %v930_v13 = vpop.f32.mrf.mxu0 }
 0x251   : > { %v931_v14 = vadd.f32 %v2590_v8, %v930_v13 }
 0x253   : > { %v943_v15 = vsel %vm936_vm4, %v931_v14, -inf }
 0x254   : > { %944 = vmax.xlane.f32.xlu0 %v943_v15 }
 0x258   : > { %v933_v18 = vpop.f32.mrf.mxu0 }
 0x259   : > { %v934_v19 = vadd.f32 %v2590_v8, %v933_v18 }
 0x25b   : > { %v946_v21 = vsel %vm936_vm4, %v934_v19, -inf }
 0x25c   : > { %938 = vmax.xlane.f32.xlu0 %v937_v20  ;;  %947 = vmax.xlane.f32.xlu1 %v946_v21 }
 0x2bf   : > { %v942_v23 = vpop.xlane.xlu1 %941 }
 0x2c0   : > { %v950_v25 = vsub.f32 %v928_v11, %v942_v23 }
 0x2c2   : > { %v955_v26 = vmul.f32 1.442695, %v950_v25 }
 0x2c4   : > { %2598 = vpow2.f32 %v955_v26 }
 0x2c7   : > { %v945_v27 = vpop.xlane.xlu0 %944 }
 0x2c8   : > { %v951_v28 = vsub.f32 %v931_v14, %v945_v27 }
 0x2ca   : > { %v2599_v29 = vpop.eup %2598  ;;  %v957_v30 = vmul.f32 1.442695, %v951_v28 }
 0x2cb   : > { %v964_v31 = vsel %vm936_vm4, %v2599_v29, 0.0 }
 0x2cc   : > { %2600 = vpow2.f32 %v957_v30  ;;  %965 = vadd.xlane.f32.xlu1 %v964_v31 }
 0x2cf   : > { %v939_v33 = vpop.xlane.xlu0 %938  ;;  %v948_v52 = vpop.xlane.xlu1 %947 }
 0x2d0   : > { %v949_v34 = vsub.f32 %v925_v17, %v939_v33  ;;  %v952_v53 = vsub.f32 %v934_v19, %v948_v52 }
 0x2d2   : > { %v2601_v35 = vpop.eup %2600  ;;  %v953_v36 = vmul.f32 1.442695, %v949_v34  ;;  %v959_v54 = vmul.f32 1.442695, %v952_v53 }
 0x2d3   : > { %v967_v37 = vsel %vm936_vm4, %v2601_v35, 0.0 }
 0x2d4   : > { %2602 = vpow2.f32 %v953_v36  ;;  %968 = vadd.xlane.f32.xlu2 %v967_v37 }
 0x2d5   : > { %2604 = vpow2.f32 %v959_v54 }
 0x2da   : > { %v2603_v39 = vpop.eup %2602 }
 0x2db   : > { %v961_v40 = vsel %vm936_vm4, %v2603_v39, 0.0  ;;  %v2605_v55 = vpop.eup %2604 }
 0x2dc   : > { %962 = vadd.xlane.f32.xlu0 %v961_v40  ;;  %v970_v56 = vsel %vm936_vm4, %v2605_v55, 0.0 }
 0x2e5   : > { %988 = vperm.xlu1 %2581, %v2435_v46  }
 0x2ec   : > { %2576 = vperm.xlu2 %2574, %v2575_v49  }
 0x2f0   : > { %998 = vperm.xlu0 %2580, %v2437_v51   ;;  %v1298_v51 = vadd.s32 8, %v3100_v41 }
 0x30f   : > { %971 = vadd.xlane.f32.xlu1 %v970_v56 }
 0x33f   : > { %v966_v58 = vpop.xlane.xlu1 %965 }
 0x347   : > { %v969_v57 = vpop.xlane.xlu2 %968 }
 0x348   : > { %2606 = vrcp.f32 %v969_v57 }
 0x349   : > { %2608 = vrcp.f32 %v966_v58 }
 0x34e   : > { %v2607_v59 = vpop.eup %2606 }
 0x34f   : > { %v979_v60 = vmul.f32 %v2607_v59, %v2601_v35  ;;  %v2577_v61 = vpop.permute.xlu2 %2576  ;;  %v963_v62 = vpop.xlane.xlu0 %962 }
 0x350   : > { %v2578_v63 = vunpack.i.l.bf16 %v2577_v61  ;;  %2610 = vrcp.f32 %v963_v62  ;;  %v2609_v1 = vpop.eup %2608  ;;  %v2579_v3 = vunpack.i.h.bf16 %v2577_v61 }
 0x351   : > { %v978_v5 = vmul.f32 %v2609_v1, %v2599_v29 }
 0x352   : > { %v3115_v0 = vmul.f32 %v2578_v63, %v979_v60 }
 0x354   : > { %v1007_v2 = vpack.c.bf16 %v3115_v0, %v3115_v0 }
 0x356   : > { %v2611_v4 = vpop.eup %2610  ;;  %1085 = vxpose.xlu2.c.b16.start.end [1/1] (short) (narrow) %v1007_v2, 16  ;;  %v1163_v6 = vsel %vm936_vm4, %v1007_v2, 1065369472  ;;  %v1475_v44 = vsel %vm674_vm0, %v1007_v2, 0 }
 0x357   : > { %v977_v7 = vmul.f32 %v2611_v4, %v2603_v39  ;;  %v989_v8 = vpop.permute.xlu1 %988  ;;  %v1196_v9 = vsel %vm674_vm0, %v1163_v6, 0 }
 0x358   : > { %v3121_v11 = vmul.f32 %v989_v8, %v978_v5  ;;  %1205 = vmatpush.bf16.msrb.mxu2 %v1196_v9 }
 0x359   : > { %v3123_v12 = vmul.f32 %v2579_v3, %v977_v7 }
 0x35a   : > { %v3127_v13 = vpack.c.bf16 %v3121_v11, %v3121_v11 }
 0x35b   : > { %v1005_v14 = vpack.c.bf16 %v3123_v12, %v3123_v12 }
 0x35c   : > { %1049 = vxpose.xlu0.c.b16.start.end [1/1] (short) (narrow) %v3127_v13, 16  ;;  %v1161_v33 = vsel %vm936_vm4, %v3127_v13, 1065369472  ;;  %v1459_v3 = vsel %vm674_vm0, %v3127_v13, 0 }
 0x35d   : > { %v1159_v15 = vsel %vm936_vm4, %v1005_v14, 1065369472  ;;  %v1443_v29 = vsel %vm674_vm0, %v1005_v14, 0  ;;  %v1181_v35 = vsel %vm674_vm0, %v1161_v33, 0 }
 0x35e   : > { %v1166_v17 = vsel %vm674_vm0, %v1159_v15, 0 }
 0x35f   : > { %1175 = vmatpush.bf16.msrb.mxu0 %v1166_v17 }
 0x362   : > { %2463 = vmatmul.msk.bf16.vlgmr.msrb.gmra.mxu0 %vm711_vm2, %v3006_v10  ;;  %v999_v20 = vpop.permute.xlu0 %998 }
 0x382   : > { %v972_v18 = vpop.xlane.xlu1 %971 }
 0x383   : > { %2612 = vrcp.f32 %v972_v18 }
 0x389   : > { %v2613_v19 = vpop.eup %2612 }
 0x38a   : > { %v980_v21 = vmul.f32 %v2613_v19, %v2605_v55 }
 0x38c   : > { %v3136_v22 = vmul.f32 %v999_v20, %v980_v21 }
 0x38e   : > { %v3140_v23 = vpack.c.bf16 %v3136_v22, %v3136_v22 }
 0x390   : > { %2582 = vxpose.binary.xlu1.c.b16.start.end [1/2] (short) (narrow) %v3140_v23, %v1005_v14, 16  ;;  %v1165_v25 = vsel %vm936_vm4, %v3140_v23, 1065369472  ;;  %v1491_v1 = vsel %vm674_vm0, %v3140_v23, 0 }
 0x391   : > { %v1211_v26 = vsel %vm674_vm0, %v1165_v25, 0 }
 0x392   : > { %1220 = vmatpush.bf16.msra.mxu3 %v1211_v26 }
 0x3df   : > { %v3146_v10 = vpop.f32.mrf.mxu0 }
 0x3e0   : > { %v1226_v27 = vpack.c.bf16 %v3146_v10, %v3146_v10 }
 0x3e2   : > { %v1231_v28 = vsel %vm674_vm0, %v1226_v27, 0 }
 0x3e3   : > { %1240 = vmatpush.bf16.msra.mxu0 %v1231_v28 }
 0x3e7   : > { %1452 = vmatpush.bf16.msrb.mxu0 %v1443_v29  ;;  %v1179_v30 = vpop.f32.mrf.mxu0 }
 0x3f7   : > { %v1093_v31 = vpop.trf.xlu2 }
 0x3f8   : > { %2461 = vmatmul.msk.bf16.vlgmr.msra.gmra.mxu2 %vm711_vm2, %v1093_v31 }
 0x408   : > { %2465 = vmatmul.msk.bf16.vlgmr.msrb.gmra.mxu2 %vm711_vm2, %v3030_v24  ;;  %v1057_v37 = vpop.trf.xlu0 }
 0x43c   : > { %v2583_v34 = vpop.trf.xlu1 }
 0x43d   : > { %2459 = vmatmul.msk.bf16.vlgmr.msra.gmra.mxu1 %vm711_vm2, %v2583_v34  ;;  %2467 = vmatmul.msk.bf16.vlgmr.msra.gmra.mxu0 %vm711_vm2, %v2583_v34 }
 0x43e   : > { %1190 = vmatpush.bf16.msra.mxu1 %v1181_v35 }
 0x444   : > { %v2584_v36 = vpop.trf.xlu1 }
 0x445   : > { %2462 = vmatmul.msk.bf16.vlgmr.msrb.gmra.mxu3 %vm711_vm2, %v2584_v36 }
 0x44d   : > { %2460 = vmatmul.msk.bf16.vlgmr.msrb.gmra.mxu1 %vm711_vm2, %v1057_v37  ;;  %2471 = vmatmul.msk.bf16.vlgmr.msrb.gmra.mxu0 %vm711_vm2, %v2583_v34 }
 0x455   : > { %2466 = vmatmul.msk.bf16.vlgmr.msra.gmra.mxu3 %vm711_vm2, %v3045_v32 }
 0x45d   : > { %2464 = vmatmul.msk.bf16.vlgmr.msra.gmra.mxu1 %vm711_vm2, %v3015_v16  ;;  %v1300_v16 = vand.u32 127, %v638_v38 }
 0x45f   : > { %vm3181_vm9 = vcmp.eq.s32.totalorder %v3100_v41, %v1300_v16  ;;  %vm3197_vm10 = vcmp.eq.s32.totalorder %v1298_v51, %v1300_v16 }
 0x47b   : > { %v3167_v24 = vpop.f32.mrf.mxu2 }
 0x483   : > { %v3169_v39 = vpop.f32.mrf.mxu2 }
 0x48b   : > { %v3171_v40 = vpop.f32.mrf.mxu2 }
 0x48c   : > { %v1228_v42 = vpack.c.bf16 %v3171_v40, %v3171_v40 }
 0x48e   : > { %v1265_v43 = vsel %vm674_vm0, %v1228_v42, 0 }
 0x48f   : > { %1274 = vmatpush.bf16.msra.mxu2 %v1265_v43 }
 0x492   : > { %2469 = vmatmul.msk.bf16.vlgmr.msra.gmra.mxu2 %vm711_vm2, %v1093_v31 }
 0x493   : > { %1484 = vmatpush.bf16.msrb.mxu2 %v1475_v44  ;;  %v1209_v32 = vpop.f32.mrf.mxu2 }
 0x4a2   : > { %2473 = vmatmul.msk.bf16.vlgmr.msrb.gmra.mxu2 %vm711_vm2, %v1093_v31 }
 0x4ba   : > { %v3185_v47 = vpop.f32.mrf.mxu1  ;;  %v3187_v48 = vpop.f32.mrf.mxu0 }
 0x4bb   : > { %v3192_v49 = vsel %vm3181_vm9, 0.0, %v3187_v48 }
 0x4bc   : > { %v1741_v50 = vsel %vm936_vm4, %v3192_v49, 0.0 }
 0x4bd   : > { %1742 = vadd.xlane.f32.xlu2 %v1741_v50 }
 0x4c2   : > { %v3201_v52 = vpop.f32.mrf.mxu1  ;;  %v3203_v53 = vpop.f32.mrf.mxu0 }
 0x4c3   : > { %v3208_v54 = vsel %vm3197_vm10, 0.0, %v3203_v53 }
 0x4c4   : > { %v1744_v55 = vsel %vm936_vm4, %v3208_v54, 0.0 }
 0x4c5   : > { %1745 = vadd.xlane.f32.xlu1 %v1744_v55 }
 0x4c8   : > { %v3212_v56 = vpop.f32.mrf.mxu3 }
 0x4ca   : > { %v3214_v41 = vpop.f32.mrf.mxu1  ;;  %v3247_v9 = vpop.f32.mrf.mxu0 }
 0x4cb   : > { %v1507_v13 = vmul.f32 %v3247_v9, %v3247_v9 }
 0x4cd   : > { %v1515_v18 = vsel %vm936_vm4, %v1507_v13, 0.0 }
 0x4d0   : > { %v3216_v57 = vpop.f32.mrf.mxu3 }
 0x4d2   : > { %v3218_v58 = vpop.f32.mrf.mxu1 }
 0x4d8   : > { %v3220_v59 = vpop.f32.mrf.mxu3 }
 0x4d9   : > { %v1229_v60 = vpack.c.bf16 %v3220_v59, %v3220_v59 }
 0x4da   : > { %v3224_v61 = vpop.f32.mrf.mxu1 }
 0x4db   : > { %v1227_v62 = vpack.c.bf16 %v3224_v61, %v3224_v61  ;;  %v1282_v63 = vsel %vm674_vm0, %v1229_v60, 0 }
 0x4dc   : > { %1291 = vmatpush.bf16.msrb.mxu3 %v1282_v63 }
 0x4dd   : > { %v1248_v2 = vsel %vm674_vm0, %v1227_v62, 0 }
 0x4de   : > { %1257 = vmatpush.bf16.msrb.mxu1 %v1248_v2  ;;  %v2016_v2 = vld [vmem:[#allocation2 + $0x18] sm:$0xff] }
 0x4df   : > { %2470 = vmatmul.msk.bf16.vlgmr.msrb.gmra.mxu3 %vm711_vm2, %v2584_v36 }
 0x4e0   : > { %1500 = vmatpush.bf16.msra.mxu3 %v1491_v1  ;;  %v1224_v4 = vpop.f32.mrf.mxu3 }
 0x4e1   : > { %2468 = vmatmul.msk.bf16.vlgmr.msrb.gmra.mxu1 %vm711_vm2, %v1057_v37 }
 0x4e2   : > { %1468 = vmatpush.bf16.msra.mxu1 %v1459_v3  ;;  %v1194_v5 = vpop.f32.mrf.mxu1  ;;  %v2015_v3 = vld [vmem:[#allocation2 + $0x10] sm:$0xff] }
 0x4e3   : > { %v2014_v5 = vld [vmem:[#allocation2 + $0x8] sm:$0xff] }
 0x4ef   : > { %2474 = vmatmul.msk.bf16.vlgmr.msra.gmra.mxu3 %vm711_vm2, %v2584_v36 }
 0x4f1   : > { %2472 = vmatmul.msk.bf16.vlgmr.msra.gmra.mxu1 %vm711_vm2, %v1057_v37 }
 0x515   : > { %v3238_v6 = vpop.f32.mrf.mxu2 }
 0x516   : > { %v3243_v7 = vsel %vm3181_vm9, 0.0, %v3238_v6 }
 0x517   : > { %v1753_v8 = vsel %vm936_vm4, %v3243_v7, 0.0 }
 0x518   : > { %1754 = vadd.xlane.f32.xlu0 %v1753_v8  ;;  %v2013_v8 = vld [vmem:[#allocation2] sm:$0xff] }
 0x51d   : > { %v3251_v14 = vpop.f32.mrf.mxu2 }
 0x51e   : > { %v3256_v15 = vsel %vm3197_vm10, 0.0, %v3251_v14 }
 0x51f   : > { %v1756_v17 = vsel %vm936_vm4, %v3256_v15, 0.0 }
 0x520   : > { %1757 = vadd.xlane.f32.xlu2 %v1756_v17  ;;  %1516 = vadd.xlane.f32.xlu0 %v1515_v18 }
 0x530   : > { %v1743_v19 = vpop.xlane.xlu2 %1742 }
 0x531   : > { %2614 = vrsqrt.f32 %v1743_v19  ;;  %vm1772_vm11 = vcmp.eq.f32.partialorder %v1743_v19, inf  ;;  %v1775_v36 = vand.u32 2147483648, %v1743_v19  ;;  %vm1774_vm12 = vcmp.eq.f32.partialorder %v1743_v19, 0.0 }
 0x537   : > { %v2615_v20 = vpop.eup %2614 }
 0x538   : > { %v1766_v21 = vmul.f32 %v2615_v20, %v1743_v19  ;;  %v1746_v23 = vpop.xlane.xlu1 %1745 }
 0x539   : > { %2616 = vrsqrt.f32 %v1746_v23  ;;  %vm1784_vm13 = vcmp.eq.f32.partialorder %v1746_v23, inf  ;;  %v1787_v32 = vand.u32 2147483648, %v1746_v23  ;;  %vm1786_vm14 = vcmp.eq.f32.partialorder %v1746_v23, 0.0 }
 0x53a   : > { %v1767_v25 = vmul.f32 %v2615_v20, %v1766_v21  ;;  %v3293_v21 = vpop.f32.mrf.mxu0 }
 0x53c   : > { %v1768_v26 = vmul.f32 0.5, %v1767_v25  ;;  %v1508_v25 = vmul.f32 %v3293_v21, %v3293_v21 }
 0x53e   : > { %v1769_v27 = vsub.f32 1.5, %v1768_v26 }
 0x53f   : > { %v2617_v28 = vpop.eup %2616 }
 0x540   : > { %v1770_v29 = vmul.f32 %v2615_v20, %v1769_v27  ;;  %v1778_v30 = vmul.f32 %v2617_v28, %v1746_v23 }
 0x542   : > { %v1771_v31 = vmul.f32 %v1770_v29, %v1743_v19  ;;  %v1779_v33 = vmul.f32 %v2617_v28, %v1778_v30  ;;  %v3311_v29 = vpop.f32.mrf.mxu2 }
 0x544   : > { %v1780_v34 = vmul.f32 0.5, %v1779_v33  ;;  %v1773_v35 = vsel %vm1772_vm11, %v1743_v19, %v1771_v31 }
 0x545   : > { %v1776_v43 = vsel %vm1774_vm12, %v1775_v36, %v1773_v35 }
 0x546   : > { %v1781_v37 = vsub.f32 1.5, %v1780_v34  ;;  %v1861_v16 = vadd.f32 1e-15, %v1776_v43  ;;  %v2812_v34 = vmov 16  }
 0x547   : > { %2586 = vset.pattern.permute.xlu0 %v2812_v34  ;;  %2585 = vset.pattern.permute.xlu2 %v2812_v34 }
 0x548   : > { %v1782_v42 = vmul.f32 %v2617_v28, %v1781_v37  ;;  %2618 = vrcp.f32 %v1861_v16  ;;  %v1518_v28 = vsel %vm936_vm4, %v1508_v25, 0.0  ;;  %2587 = vset.pattern.permute.xlu1 %v2812_v34 }
 0x54a   : > { %v1783_v44 = vmul.f32 %v1782_v42, %v1746_v23 }
 0x54c   : > { %v1785_v50 = vsel %vm1784_vm13, %v1746_v23, %v1783_v44 }
 0x54d   : > { %v1788_v51 = vsel %vm1786_vm14, %v1787_v32, %v1785_v50 }
 0x54e   : > { %v1862_v55 = vadd.f32 1e-15, %v1788_v51  ;;  %v3261_v60 = vpop.eup %2618 }
 0x54f   : > { %v1877_v1 = vmul.f32 %v3261_v60, %v3185_v47 }
 0x550   : > { %2620 = vrcp.f32 %v1862_v55 }
 0x556   : > { %v3263_v62 = vpop.eup %2620 }
 0x557   : > { %v1878_v63 = vmul.f32 %v3263_v62, %v3201_v52 }
 0x559   : > { %1905 = vmatpush.msra.mxu0 %v1878_v63 }
 0x55b   : > { %1906 = vmatpush.msra.mxu0 %v1877_v1 }
 0x55c   : > { %2475 = vmatmul.msk.f32.vlgmr.msra.gmra.mxu0 %vm936_vm4, %v3192_v49 }
 0x55d   : > { %2053 = vmatpush.msrb.mxu0 %v2016_v2 }
 0x55e   : > { %v3271_v4 = vpop.f32.mrf.mxu1 }
 0x55f   : > { %2054 = vmatpush.msrb.mxu0 %v2015_v3  ;;  %v3316_v30 = vsel %vm3181_vm9, 0.0, %v3271_v4 }
 0x560   : > { %v1747_v33 = vsel %vm936_vm4, %v3316_v30, 0.0 }
 0x561   : > { %2055 = vmatpush.msrb.mxu0 %v2014_v5 }
 0x562   : > { %v3273_v13 = vpop.f32.mrf.mxu3 }
 0x563   : > { %v3278_v17 = vsel %vm3181_vm9, 0.0, %v3273_v13  ;;  %2056 = vmatpush.msrb.mxu0 %v2013_v8 }
 0x564   : > { %2476 = vmatmul.msk.f32.gmra.mxu0 %vm936_vm4, %v3208_v54  ;;  %v1759_v49 = vsel %vm936_vm4, %v3278_v17, 0.0 }
 0x565   : > { %1760 = vadd.xlane.f32.xlu2 %v1759_v49 }
 0x566   : > { %v3284_v18 = vpop.f32.mrf.mxu1 }
 0x567   : > { %v3289_v19 = vsel %vm3197_vm10, 0.0, %v3284_v18 }
 0x568   : > { %v1750_v20 = vsel %vm936_vm4, %v3289_v19, 0.0 }
 0x569   : > { %1751 = vadd.xlane.f32.xlu1 %v1750_v20 }
 0x56a   : > { %v3295_v23 = vpop.f32.mrf.mxu3 }
 0x56b   : > { %v3300_v54 = vsel %vm3197_vm10, 0.0, %v3295_v23 }
 0x56c   : > { %2483 = vmatmul.msk.f32.vlgmr.msrb.gmra.mxu0 %vm796_vm3, %v3185_v47  ;;  %v1762_v26 = vsel %vm936_vm4, %v3300_v54, 0.0  ;;  %v1511_v47 = vmul.f32 %v3311_v29, %v3311_v29 }
 0x56d   : > { %1763 = vadd.xlane.f32.xlu2 %v1762_v26 }
 0x56e   : > { %v3308_v27 = vpop.f32.mrf.mxu1  ;;  %v1527_v42 = vsel %vm936_vm4, %v1511_v47, 0.0 }
 0x56f   : > { %v1509_v37 = vmul.f32 %v3308_v27, %v3308_v27 }
 0x571   : > { %1519 = vadd.xlane.f32.xlu1 %v1518_v28  ;;  %v1521_v32 = vsel %vm936_vm4, %v1509_v37, 0.0 }
 0x572   : > { %v3318_v31 = vpop.f32.mrf.mxu3 }
 0x573   : > { %v1513_v16 = vmul.f32 %v3318_v31, %v3318_v31 }
 0x574   : > { %2484 = vmatmul.msk.f32.gmra.mxu0 %vm796_vm3, %v3201_v52 }
 0x575   : > { %1748 = vadd.xlane.f32.xlu2 %v1747_v33  ;;  %v1533_v51 = vsel %vm936_vm4, %v1513_v16, 0.0 }
 0x576   : > { %v3326_v35 = vpop.f32.mrf.mxu1 }
 0x577   : > { %v1510_v36 = vmul.f32 %v3326_v35, %v3326_v35 }
 0x579   : > { %1528 = vadd.xlane.f32.xlu1 %v1527_v42  ;;  %v1524_v52 = vsel %vm936_vm4, %v1510_v36, 0.0 }
 0x57a   : > { %v3334_v43 = vpop.f32.mrf.mxu3  ;;  %1525 = vadd.xlane.f32.xlu0 %v1524_v52 }
 0x57b   : > { %v1514_v44 = vmul.f32 %v3334_v43, %v3334_v43 }
 0x57c   : > { %2485 = vmatmul.msk.f32.gmra.mxu0 %vm796_vm3, %v3214_v41 }
 0x57d   : > { %1522 = vadd.xlane.f32.xlu2 %v1521_v32  ;;  %v1536_v50 = vsel %vm936_vm4, %v1514_v44, 0.0 }
 0x581   : > { %1537 = vadd.xlane.f32.xlu1 %v1536_v50 }
 0x582   : > { %1534 = vadd.xlane.f32.xlu0 %v1533_v51 }
 0x584   : > { %2486 = vmatmul.msk.f32.gmra.mxu0 %vm796_vm3, %v3218_v58 }
 0x58b   : > { %v1755_v55 = vpop.xlane.xlu0 %1754 }
 0x58c   : > { %2622 = vrsqrt.f32 %v1755_v55  ;;  %2487 = vmatmul.msk.f32.gmra.mxu0 %vm796_vm3, %v3167_v24  ;;  %vm1820_vm15 = vcmp.eq.f32.partialorder %v1755_v55, inf  ;;  %v1823_v34 = vand.u32 2147483648, %v1755_v55  ;;  %vm1822_vm0 = vcmp.eq.f32.partialorder %v1755_v55, 0.0 }
 0x592   : > { %v2623_v63 = vpop.eup %2622 }
 0x593   : > { %v1814_v1 = vmul.f32 %v2623_v63, %v1755_v55  ;;  %v1758_v2 = vpop.xlane.xlu2 %1757 }
 0x594   : > { %2624 = vrsqrt.f32 %v1758_v2  ;;  %2488 = vmatmul.msk.f32.gmra.mxu0 %vm796_vm3, %v3169_v39  ;;  %vm1832_vm2 = vcmp.eq.f32.partialorder %v1758_v2, inf  ;;  %vm1834_vm5 = vcmp.eq.f32.partialorder %v1758_v2, 0.0 }
 0x595   : > { %v1815_v3 = vmul.f32 %v2623_v63, %v1814_v1  ;;  %1369 = vperm.xlu2 %2585, %v3146_v10  }
 0x596   : > { %1374 = vperm.xlu0 %2586, %v3224_v61  }
 0x597   : > { %v1816_v5 = vmul.f32 0.5, %v1815_v3 }
 0x599   : > { %v1817_v8 = vsub.f32 1.5, %v1816_v5 }
 0x59a   : > { %v2625_v49 = vpop.eup %2624  ;;  %1379 = vperm.xlu1 %2587, %v3171_v40   ;;  %v1835_v40 = vand.u32 2147483648, %v1758_v2 }
 0x59b   : > { %v1818_v20 = vmul.f32 %v2623_v63, %v1817_v8  ;;  %v1826_v25 = vmul.f32 %v2625_v49, %v1758_v2  ;;  %v3366_v63 = vpop.f32.mrf.mxu2 }
 0x59c   : > { %2489 = vmatmul.msk.f32.gmra.mxu0 %vm796_vm3, %v3212_v56  ;;  %v1512_v1 = vmul.f32 %v3366_v63, %v3366_v63 }
 0x59d   : > { %v1819_v26 = vmul.f32 %v1818_v20, %v1755_v55  ;;  %v1827_v28 = vmul.f32 %v2625_v49, %v1826_v25  ;;  %v1517_v20 = vpop.xlane.xlu0 %1516 }
 0x59f   : > { %v1828_v47 = vmul.f32 0.5, %v1827_v28  ;;  %v1821_v33 = vsel %vm1820_vm15, %v1755_v55, %v1819_v26 }
 0x5a0   : > { %v1824_v61 = vsel %vm1822_vm0, %v1823_v34, %v1821_v33 }
 0x5a1   : > { %v1829_v36 = vsub.f32 1.5, %v1828_v47  ;;  %v1865_v42 = vadd.f32 1e-15, %v1824_v61 }
 0x5a3   : > { %v1830_v10 = vmul.f32 %v2625_v49, %v1829_v36  ;;  %2626 = vrcp.f32 %v1865_v42 }
 0x5a4   : > { %2490 = vmatmul.msk.f32.gmra.mxu0 %vm796_vm3, %v3216_v57 }
 0x5a5   : > { %v1831_v37 = vmul.f32 %v1830_v10, %v1758_v2 }
 0x5a7   : > { %v1833_v52 = vsel %vm1832_vm2, %v1758_v2, %v1831_v37  ;;  %v1530_v2 = vsel %vm936_vm4, %v1512_v1, 0.0 }
 0x5a8   : > { %v1836_v44 = vsel %vm1834_vm5, %v1835_v40, %v1833_v52 }
 0x5a9   : > { %v1866_v32 = vadd.f32 1e-15, %v1836_v44  ;;  %v3358_v16 = vpop.eup %2626 }
 0x5aa   : > { %v1881_v55 = vmul.f32 %v3358_v16, %v3167_v24 }
 0x5ab   : > { %2628 = vrcp.f32 %v1866_v32 }
 0x5b1   : > { %v3360_v50 = vpop.eup %2628 }
 0x5b2   : > { %v1882_v51 = vmul.f32 %v3360_v50, %v3169_v39 }
 0x5b4   : > { %1963 = vmatpush.msra.mxu2 %v1882_v51 }
 0x5b6   : > { %1964 = vmatpush.msra.mxu2 %v1881_v55 }
 0x5b7   : > { %2479 = vmatmul.msk.f32.vlgmr.msra.gmra.mxu2 %vm936_vm4, %v3243_v7 }
 0x5be   : > { %1531 = vadd.xlane.f32.xlu2 %v1530_v2 }
 0x5bf   : > { %2480 = vmatmul.msk.f32.gmra.mxu2 %vm936_vm4, %v3256_v15 }
 0x5d6   : > { %1384 = vperm.xlu2 %2585, %v3220_v59  }
 0x5d8   : > { %v1761_v39 = vpop.xlane.xlu2 %1760 }
 0x5d9   : > { %2630 = vrsqrt.f32 %v1761_v39  ;;  %vm1844_vm6 = vcmp.eq.f32.partialorder %v1761_v39, inf  ;;  %vm1846_vm7 = vcmp.eq.f32.partialorder %v1761_v39, 0.0 }
 0x5dc   : > { %v1752_v24 = vpop.xlane.xlu1 %1751 }
 0x5dd   : > { %2632 = vrsqrt.f32 %v1752_v24  ;;  %vm1808_vm8 = vcmp.eq.f32.partialorder %v1752_v24, inf  ;;  %vm1810_vm11 = vcmp.eq.f32.partialorder %v1752_v24, 0.0 }
 0x5df   : > { %v2631_v3 = vpop.eup %2630 }
 0x5e0   : > { %v1838_v5 = vmul.f32 %v2631_v3, %v1761_v39  ;;  %v3376_v8 = vpop.xlane.xlu2 %1763 }
 0x5e1   : > { %2634 = vrsqrt.f32 %v3376_v8  ;;  %vm1856_vm12 = vcmp.eq.f32.partialorder %v3376_v8, inf  ;;  %vm1858_vm13 = vcmp.eq.f32.partialorder %v3376_v8, 0.0 }
 0x5e2   : > { %v1839_v7 = vmul.f32 %v2631_v3, %v1838_v5 }
 0x5e3   : > { %v2633_v49 = vpop.eup %2632 }
 0x5e4   : > { %v1840_v25 = vmul.f32 0.5, %v1839_v7  ;;  %v1802_v26 = vmul.f32 %v2633_v49, %v1752_v24  ;;  %v1520_v28 = vpop.xlane.xlu1 %1519  ;;  %v1847_v7 = vand.u32 2147483648, %v1761_v39 }
 0x5e5   : > { %v1539_v47 = vadd.f32 %v1520_v28, %v1517_v20  ;;  %v1811_v28 = vand.u32 2147483648, %v1752_v24 }
 0x5e6   : > { %v1841_v15 = vsub.f32 1.5, %v1840_v25  ;;  %v1803_v33 = vmul.f32 %v2633_v49, %v1802_v26 }
 0x5e7   : > { %v2635_v59 = vpop.eup %2634  ;;  %v1540_v34 = vrot.slane %v1539_v47, 4 }
 0x5e8   : > { %v1842_v36 = vmul.f32 %v2631_v3, %v1841_v15  ;;  %v1804_v10 = vmul.f32 0.5, %v1803_v33  ;;  %v1850_v61 = vmul.f32 %v2635_v59, %v3376_v8  ;;  %v3380_v37 = vpop.xlane.xlu2 %1748 }
 0x5e9   : > { %v1541_v40 = vadd.f32 %v1540_v34, %v1539_v47  ;;  %2636 = vrsqrt.f32 %v3380_v37  ;;  %vm1796_vm14 = vcmp.eq.f32.partialorder %v3380_v37, inf  ;;  %vm1798_vm15 = vcmp.eq.f32.partialorder %v3380_v37, 0.0 }
 0x5ea   : > { %v1843_v42 = vmul.f32 %v1842_v36, %v1761_v39  ;;  %v1805_v52 = vsub.f32 1.5, %v1804_v10  ;;  %v1851_v44 = vmul.f32 %v2635_v59, %v1850_v61 }
 0x5eb   : > { %v1542_v32 = vrot.slane %v1541_v40, 2 }
 0x5ec   : > { %v1806_v51 = vmul.f32 %v2633_v49, %v1805_v52  ;;  %v1852_v55 = vmul.f32 0.5, %v1851_v44  ;;  %v3383_v1 = vpop.xlane.xlu1 %1528  ;;  %v1845_v3 = vsel %vm1844_vm6, %v1761_v39, %v1843_v42  ;;  %v3393_v44 = vld [vmem:[%s3691_s10 + $0x18] sm:$0xff] }
 0x5ed   : > { %v1543_v2 = vadd.f32 %v1542_v32, %v1541_v40  ;;  %v1526_v5 = vpop.xlane.xlu0 %1525  ;;  %v1848_v36 = vsel %vm1846_vm7, %v1847_v7, %v1845_v3  ;;  %2505 = vmatpush.msrb.mxu2 %v3393_v44 }
 0x5ee   : > { %v1807_v20 = vmul.f32 %v1806_v51, %v1752_v24  ;;  %v1853_v25 = vsub.f32 1.5, %v1852_v55  ;;  %v1867_v32 = vadd.f32 1e-15, %v1848_v36 }
 0x5ef   : > { %v2637_v26 = vpop.eup %2636  ;;  %v1544_v47 = vrot.slane %v1543_v2, 1 }
 0x5f0   : > { %v1809_v15 = vsel %vm1808_vm8, %v1752_v24, %v1807_v20  ;;  %v1854_v33 = vmul.f32 %v2635_v59, %v1853_v25  ;;  %v1790_v34 = vmul.f32 %v2637_v26, %v3380_v37  ;;  %v1523_v49 = vpop.xlane.xlu2 %1522  ;;  %v1859_v24 = vand.u32 2147483648, %v3376_v8 }
 0x5f1   : > { %v3386_v10 = vadd.f32 %v1544_v47, %v1543_v2  ;;  %v1546_v61 = vadd.f32 %v1526_v5, %v1523_v49  ;;  %v1812_v40 = vsel %vm1810_vm11, %v1811_v28, %v1809_v15  ;;  %v3403_v5 = vld [vmem:[%s3691_s10 + $0x10] sm:$0xff] }
 0x5f2   : > { %v1855_v42 = vmul.f32 %v1854_v33, %v3376_v8  ;;  %v1791_v39 = vmul.f32 %v2637_v26, %v1790_v34  ;;  %v1864_v52 = vadd.f32 1e-15, %v1812_v40  ;;  %2506 = vmatpush.msrb.mxu2 %v3403_v5 }
 0x5f3   : > { %2638 = vrsqrt.f32 %v3386_v10  ;;  %v1547_v59 = vrot.slane %v1546_v61, 4  ;;  %vm1573_vm2 = vweird.f32 %v3386_v10 }
 0x5f4   : > { %v1857_v51 = vsel %vm1856_vm12, %v3376_v8, %v1855_v42  ;;  %v1792_v55 = vmul.f32 0.5, %v1791_v39  ;;  %v1538_v2 = vpop.xlane.xlu1 %1537  ;;  %2640 = vrcp.f32 %v1864_v52  ;;  %v3409_v8 = vld [vmem:[%s3691_s10 + $0x8] sm:$0xff] }
 0x5f5   : > { %v1548_v3 = vadd.f32 %v1547_v59, %v1546_v61  ;;  %v1535_v7 = vpop.xlane.xlu0 %1534  ;;  %v1860_v20 = vsel %vm1858_vm13, %v1859_v24, %v1857_v51  ;;  %2642 = vrcp.f32 %v1867_v32  ;;  %2507 = vmatpush.msrb.mxu2 %v3409_v8  ;;  %v3415_v61 = vld [vmem:[%s3691_s10] sm:$0xff] }
 0x5f6   : > { %v1793_v25 = vsub.f32 1.5, %v1792_v55  ;;  %v1560_v28 = vadd.f32 %v1538_v2, %v1535_v7  ;;  %v1868_v47 = vadd.f32 1e-15, %v1860_v20 }
 0x5f7   : > { %v1549_v15 = vrot.slane %v1548_v3, 2  ;;  %2508 = vmatpush.msrb.mxu2 %v3415_v61 }
 0x5f8   : > { %v1794_v33 = vmul.f32 %v2637_v26, %v1793_v25  ;;  %v1561_v34 = vrot.slane %v1560_v28, 4  ;;  %2644 = vrcp.f32 %v1868_v47  ;;  %v1799_v26 = vand.u32 2147483648, %v3380_v37 }
 0x5f9   : > { %v2639_v49 = vpop.eup %2638  ;;  %v1550_v36 = vadd.f32 %v1549_v15, %v1548_v3 }
 0x5fa   : > { %v3417_v40 = vpop.eup %2640  ;;  %v1568_v42 = vmul.f32 %v2639_v49, %v3386_v10  ;;  %v1795_v39 = vmul.f32 %v1794_v33, %v3380_v37  ;;  %v1562_v52 = vadd.f32 %v1561_v34, %v1560_v28  ;;  %vm1574_vm0 = vweird.f32 %v2639_v49 }
 0x5fb   : > { %v1551_v24 = vrot.slane %v1550_v36, 1  ;;  %v1880_v59 = vmul.f32 %v3417_v40, %v3218_v58  ;;  %v3428_v2 = vpop.eup %2642  ;;  %vm1575_vm5 = vmor %vm1573_vm2, %vm1574_vm0  ;;  %vm2207_vm2 = vcmask 1041409  }
 0x5fc   : > { %v1569_v32 = vmul.f32 %v2639_v49, %v1568_v42  ;;  %v1563_v51 = vrot.slane %v1562_v52, 2  ;;  %v1797_v55 = vsel %vm1796_vm14, %v3380_v37, %v1795_v39  ;;  %v1883_v37 = vmul.f32 %v3428_v2, %v3212_v56 }
 0x5fd   : > { %v1552_v3 = vadd.f32 %v1551_v24, %v1550_v36  ;;  %1934 = vmatpush.msrb.mxu1 %v1880_v59  ;;  %v1800_v7 = vsel %vm1798_vm15, %v1799_v26, %v1797_v55  ;;  %v3447_v56 = vsel %vm3197_vm10, 0.25, %v2811_v45 }
 0x5fe   : > { %v3430_v20 = vpop.eup %2644  ;;  %v1564_v25 = vadd.f32 %v1563_v51, %v1562_v52  ;;  %v1863_v28 = vadd.f32 1e-15, %v1800_v7  ;;  %v1570_v47 = vmul.f32 0.5, %v1569_v32 }
 0x5ff   : > { %2646 = vrsqrt.f32 %v1552_v3  ;;  %v1884_v58 = vmul.f32 %v3430_v20, %v3216_v57  ;;  %v3442_v57 = vsel %vm3181_vm9, 0.25, %v2811_v45  ;;  %vm1583_vm7 = vweird.f32 %v1552_v3 }
 0x600   : > { %v1565_v15 = vrot.slane %v1564_v25, 1  ;;  %2648 = vrcp.f32 %v1863_v28  ;;  %v1571_v33 = vsub.f32 1.5, %v1570_v47 }
 0x601   : > { %1992 = vmatpush.msrb.mxu3 %v1884_v58 }
 0x602   : > { %v1566_v34 = vadd.f32 %v1565_v15, %v1564_v25  ;;  %v1572_v36 = vmul.f32 %v2639_v49, %v1571_v33  ;;  %v1908_v15 = vpop.f32.mrf.mxu0 }
 0x603   : > { %1993 = vmatpush.msrb.mxu3 %v1883_v37 }
 0x604   : > { %2650 = vrsqrt.f32 %v1566_v34  ;;  %2481 = vmatmul.msk.f32.vlgmr.msrb.gmra.mxu3 %vm936_vm4, %v3278_v17  ;;  %v1576_v42 = vsel %vm1575_vm5, %v2639_v49, %v1572_v36  ;;  %vm1603_vm12 = vweird.f32 %v1566_v34  ;;  %vm2209_vm5 = vcmask 1042434  }
 0x605   : > { %v2647_v39 = vpop.eup %2646  ;;  %v1607_v10 = vmul.f32 %v1576_v42, %v3247_v9  ;;  %v1608_v52 = vmul.f32 %v1576_v42, %v3293_v21 }
 0x606   : > { %v3451_v26 = vpop.eup %2648  ;;  %v1578_v24 = vmul.f32 %v2647_v39, %v1552_v3  ;;  %vm1584_vm6 = vweird.f32 %v2647_v39 }
 0x607   : > { %v1879_v17 = vmul.f32 %v3451_v26, %v3214_v41  ;;  %v1617_v49 = vsub.f32 %v1607_v10, %v3442_v57  ;;  %v1618_v59 = vsub.f32 %v1608_v52, %v3447_v56  ;;  %vm1585_vm8 = vmor %vm1583_vm7, %vm1584_vm6  ;;  %vm2211_vm6 = vcmask 1043459  }
 0x608   : > { %v1579_v32 = vmul.f32 %v2647_v39, %v1578_v24  ;;  %v1375_v42 = vpop.permute.xlu0 %1374  ;;  %v3485_v24 = vpop.permute.xlu2 %1369  ;;  %vm2267_vm7 = vcmask 27648  }
 0x609   : > { %1935 = vmatpush.msrb.mxu1 %v1879_v17  ;;  %v1625_v51 = vmul.f32 %v1617_v49, %v1617_v49  ;;  %v1626_v45 = vmul.f32 %v1618_v59, %v1618_v59  ;;  %v1307_v17 = vsel %vm3181_vm9, %v3187_v48, 0.0  ;;  %v1313_v48 = vsel %vm3181_vm9, %v3273_v13, 0.0 }
 0x60a   : > { %v2651_v55 = vpop.eup %2650  ;;  %2477 = vmatmul.msk.f32.vlgmr.msrb.gmra.mxu1 %vm936_vm4, %v3316_v30  ;;  %v1580_v9 = vmul.f32 0.5, %v1579_v32  ;;  %v1911_v10 = vpop.f32.mrf.mxu0  ;;  %v1315_v49 = vsel %vm936_vm4, %v1307_v17, 0.0 }
 0x60b   : > { %v1598_v21 = vmul.f32 %v2651_v55, %v1566_v34  ;;  %v1633_v7 = vsel %vm936_vm4, %v1625_v51, 0.0  ;;  %v1636_v25 = vsel %vm936_vm4, %v1626_v45, 0.0  ;;  %2118 = vmatpush.msra.mxu1 %v3393_v44  ;;  %vm1604_vm11 = vweird.f32 %v2651_v55 }
 0x60c   : > { %2482 = vmatmul.msk.f32.gmra.mxu3 %vm936_vm4, %v3300_v54  ;;  %1634 = vadd.xlane.f32.xlu2 %v1633_v7  ;;  %v1581_v41 = vsub.f32 1.5, %v1580_v9  ;;  %vm1605_vm13 = vmor %vm1603_vm12, %vm1604_vm11  ;;  %v2002_v52 = vmul.f32 %v3263_v62, %v1911_v10  ;;  %v1310_v62 = vsel %vm3197_vm10, %v3284_v18, 0.0 }
 0x60d   : > { %v1599_v28 = vmul.f32 %v2651_v55, %v1598_v21  ;;  %1637 = vadd.xlane.f32.xlu0 %v1636_v25  ;;  %2119 = vmatpush.msra.mxu1 %v3403_v5  ;;  %v1324_v51 = vsel %vm936_vm4, %v1310_v62, 0.0  ;;  %v1333_v25 = vsel %vm936_vm4, %v1313_v48, 0.0 }
 0x60e   : > { %v1582_v47 = vmul.f32 %v2647_v39, %v1581_v41 }
 0x60f   : > { %2120 = vmatpush.msra.mxu1 %v3409_v8  ;;  %v1600_v30 = vmul.f32 0.5, %v1599_v28 }
 0x610   : > { %v3466_v58 = vsel %vm1585_vm8, %v2647_v39, %v1582_v47  ;;  %v1388_v39 = vmul.f32 %v1375_v42, %v3121_v11 }
 0x611   : > { %v1609_v44 = vmul.f32 %v3466_v58, %v3308_v27  ;;  %2121 = vmatpush.msra.mxu1 %v3415_v61  ;;  %v1601_v54 = vsub.f32 1.5, %v1600_v30  ;;  %v2001_v27 = vmul.f32 %v3261_v60, %v1908_v15 }
 0x612   : > { %2478 = vmatmul.msk.f32.gmra.mxu1 %vm936_vm4, %v3289_v19 }
 0x613   : > { %v1619_v5 = vsub.f32 %v1609_v44, %v3442_v57  ;;  %v1602_v3 = vmul.f32 %v2651_v55, %v1601_v54 }
 0x615   : > { %v1627_v8 = vmul.f32 %v1619_v5, %v1619_v5  ;;  %v1606_v33 = vsel %vm1605_vm13, %v2651_v55, %v1602_v3 }
 0x616   : > { %v1613_v37 = vmul.f32 %v1606_v33, %v3318_v31  ;;  %v1392_v31 = vmul.f32 %v1388_v39, %v3121_v11 }
 0x617   : > { %v1639_v36 = vsel %vm936_vm4, %v1627_v8, 0.0 }
 0x618   : > { %1640 = vadd.xlane.f32.xlu2 %v1639_v36  ;;  %v1623_v61 = vsub.f32 %v1613_v37, %v3442_v57  ;;  %v1398_v60 = vsel %vm936_vm4, %v1392_v31, 0.0 }
 0x61a   : > { %2491 = vmatmul.msk.f32.vlgmr.msra.gmra.mxu1 %vm796_vm3, %v2001_v27  ;;  %v1631_v19 = vmul.f32 %v1623_v61, %v1623_v61  ;;  %v1380_v61 = vpop.permute.xlu1 %1379 }
 0x61b   : > { %v1389_v42 = vmul.f32 %v1380_v61, %v3115_v0 }
 0x61c   : > { %v1651_v34 = vsel %vm936_vm4, %v1631_v19, 0.0 }
 0x61d   : > { %1652 = vadd.xlane.f32.xlu0 %v1651_v34  ;;  %v1393_v39 = vmul.f32 %v1389_v42, %v3115_v0  ;;  %v1314_v0 = vsel %vm3197_vm10, %v3295_v23, 0.0 }
 0x61e   : > { %v1336_v10 = vsel %vm936_vm4, %v1314_v0, 0.0 }
 0x622   : > { %2492 = vmatmul.msk.f32.gmra.mxu1 %vm796_vm3, %v2002_v52 }
 0x625   : > { %1399 = vadd.xlane.f32.xlu0 %v1398_v60 }
 0x62d   : > { %1316 = vadd.xlane.f32.xlu0 %v1315_v49 }
 0x631   : > { %v1532_v59 = vpop.xlane.xlu2 %1531 }
 0x632   : > { %v1553_v11 = vadd.f32 %v1532_v59, %v3383_v1 }
 0x634   : > { %v1554_v32 = vrot.slane %v1553_v11, 4 }
 0x635   : > { %1325 = vadd.xlane.f32.xlu0 %v1324_v51 }
 0x636   : > { %v1555_v45 = vadd.f32 %v1554_v32, %v1553_v11 }
 0x638   : > { %v1556_v55 = vrot.slane %v1555_v45, 2 }
 0x63a   : > { %v1557_v9 = vadd.f32 %v1556_v55, %v1555_v45  ;;  %v1966_v21 = vpop.f32.mrf.mxu2 }
 0x63b   : > { %v2005_v23 = vmul.f32 %v3358_v16, %v1966_v21  ;;  %v2197_v16 = vld [vmem:[#allocation5 + $0x10] sm:$0xff] }
 0x63c   : > { %v1558_v7 = vrot.slane %v1557_v9, 1 }
 0x63d   : > { %1334 = vadd.xlane.f32.xlu0 %v1333_v25 }
 0x63e   : > { %v1559_v41 = vadd.f32 %v1558_v7, %v1557_v9  ;;  %v2198_v9 = vld [vmem:[#allocation5 + $0x18] sm:$0xff]  ;;  %v2595_v7 = vld [vmem:[%s3693_s12] ss:$0 sm:$0xff] }
 0x63f   : > { %2227 = vmatpush.msra.mxu2 %v2198_v9 }
 0x640   : > { %2652 = vrsqrt.f32 %v1559_v41  ;;  %vm1593_vm15 = vweird.f32 %v1559_v41 }
 0x641   : > { %2228 = vmatpush.msra.mxu2 %v2197_v16 }
 0x642   : > { %v1969_v18 = vpop.f32.mrf.mxu2 }
 0x643   : > { %v2006_v1 = vmul.f32 %v3360_v50, %v1969_v18  ;;  %v1614_v50 = vmul.f32 %v1606_v33, %v3334_v43  ;;  %v1308_v43 = vsel %vm3197_vm10, %v3203_v53, 0.0  ;;  %v1311_v33 = vsel %vm3181_vm9, %v3238_v6, 0.0  ;;  %v2195_v18 = vld [vmem:[#allocation5] sm:$0xff] }
 0x644   : > { %v1327_v34 = vsel %vm936_vm4, %v1311_v33, 0.0 }
 0x645   : > { %2496 = vmatmul.msk.f32.vlgmr.msrb.gmra.mxu2 %vm796_vm3, %v2006_v1  ;;  %v1624_v36 = vsub.f32 %v1614_v50, %v3447_v56 }
 0x646   : > { %v2653_v28 = vpop.eup %2652 }
 0x647   : > { %v1588_v47 = vmul.f32 %v2653_v28, %v1559_v41  ;;  %vm1594_vm14 = vweird.f32 %v2653_v28  ;;  %v1632_v27 = vmul.f32 %v1624_v36, %v1624_v36  ;;  %v2196_v41 = vld [vmem:[#allocation5 + $0x8] sm:$0xff] }
 0x648   : > { %vm1595_vm0 = vmor %vm1593_vm15, %vm1594_vm14  ;;  %2229 = vmatpush.msra.mxu2 %v2196_v41  ;;  %vm2297_vm14 = vcmask 39936   ;;  %vm2299_vm15 = vcmask 48128  }
 0x649   : > { %v1589_v30 = vmul.f32 %v2653_v28, %v1588_v47  ;;  %v1654_v19 = vsel %vm936_vm4, %v1632_v27, 0.0 }
 0x64a   : > { %2230 = vmatpush.msra.mxu2 %v2195_v18 }
 0x64b   : > { %v1590_v44 = vmul.f32 0.5, %v1589_v30 }
 0x64d   : > { %v1591_v54 = vsub.f32 1.5, %v1590_v44 }
 0x64f   : > { %v1592_v13 = vmul.f32 %v2653_v28, %v1591_v54  ;;  %v2239_v54 = vld [vmem:[%s3696_s15 + $0x18] sm:$0xff] }
 0x650   : > { %2259 = vmatpush.msra.mxu3 %v2239_v54 }
 0x651   : > { %v3502_v15 = vsel %vm1595_vm0, %v2653_v28, %v1592_v13 }
 0x652   : > { %v1611_v5 = vmul.f32 %v3502_v15, %v3311_v29  ;;  %v1401_v29 = vsel %vm936_vm4, %v1393_v39, 0.0 }
 0x654   : > { %v1621_v3 = vsub.f32 %v1611_v5, %v3442_v57  ;;  %v1318_v57 = vsel %vm936_vm4, %v1308_v43, 0.0 }
 0x656   : > { %v1629_v8 = vmul.f32 %v1621_v3, %v1621_v3 }
 0x658   : > { %v1645_v37 = vsel %vm936_vm4, %v1629_v8, 0.0 }
 0x659   : > { %1646 = vadd.xlane.f32.xlu2 %v1645_v37 }
 0x661   : > { %1655 = vadd.xlane.f32.xlu2 %v1654_v19 }
 0x669   : > { %1402 = vadd.xlane.f32.xlu2 %v1401_v29 }
 0x671   : > { %1319 = vadd.xlane.f32.xlu2 %v1318_v57 }
 0x679   : > { %1328 = vadd.xlane.f32.xlu2 %v1327_v34 }
 0x680   : > { %v1638_v38 = vpop.xlane.xlu0 %1637 }
 0x681   : > { %1337 = vadd.xlane.f32.xlu2 %v1336_v10 }
 0x687   : > { %v1937_v52 = vpop.f32.mrf.mxu1  ;;  %v1995_v31 = vpop.f32.mrf.mxu3 }
 0x688   : > { %v2003_v53 = vmul.f32 %v3451_v26, %v1937_v52  ;;  %v2007_v60 = vmul.f32 %v3428_v2, %v1995_v31  ;;  %v2058_v26 = vpop.f32.mrf.mxu0 }
 0x68a   : > { %2493 = vmatmul.msk.f32.gmra.mxu1 %vm796_vm3, %v2003_v53  ;;  %2497 = vmatmul.msk.f32.gmra.mxu2 %vm796_vm3, %v2007_v60 }
 0x68f   : > { %v1940_v6 = vpop.f32.mrf.mxu1  ;;  %v1998_v17 = vpop.f32.mrf.mxu3 }
 0x690   : > { %v2004_v49 = vmul.f32 %v3417_v40, %v1940_v6  ;;  %v2008_v59 = vmul.f32 %v3430_v20, %v1998_v17  ;;  %v2061_v2 = vpop.f32.mrf.mxu0 }
 0x692   : > { %2494 = vmatmul.msk.f32.gmra.mxu1 %vm796_vm3, %v2004_v49  ;;  %2498 = vmatmul.msk.f32.gmra.mxu2 %vm796_vm3, %v2008_v59 }
 0x697   : > { %v2123_v32 = vpop.f32.mrf.mxu1 }
 0x698   : > { %v2064_v62 = vpop.f32.mrf.mxu0  ;;  %v2124_v20 = vadd.f32 %v2123_v32, %v2058_v26 }
 0x69a   : > { %2495 = vmatmul.msk.f32.gmra.mxu1 %vm796_vm3, %v2005_v23  ;;  %v2151_v28 = vadd.f32 %v2595_v7, %v2124_v20 }
 0x69c   : > { %v2159_v13 = vsel %vm796_vm3, %v2151_v28, 0.0 }
 0x69f   : > { %v2126_v45 = vpop.f32.mrf.mxu1 }
 0x6a0   : > { %v2067_v11 = vpop.f32.mrf.mxu0  ;;  %v2127_v48 = vadd.f32 %v2126_v45, %v2061_v2 }
 0x6a2   : > { %v2152_v21 = vadd.f32 %v2595_v7, %v2127_v48 }
 0x6a4   : > { %v2160_v30 = vsel %vm796_vm3, %v2152_v21, 0.0 }
 0x6a5   : > { %v2161_v3 = vadd.f32 %v2160_v30, %v2159_v13 }
 0x6a7   : > { %v2162_v27 = vrot.slane %v2161_v3, 4 }
 0x6a8   : > { %v2070_v51 = vpop.f32.mrf.mxu0 }
 0x6a9   : > { %v2163_v10 = vadd.f32 %v2162_v27, %v2161_v3  ;;  %v2237_v3 = vld [vmem:[%s3696_s15 + $0x8] sm:$0xff] }
 0x6ab   : > { %v2164_v26 = vrot.slane %v2163_v10, 2 }
 0x6b0   : > { %v2073_v55 = vpop.f32.mrf.mxu0 }
 0x6b8   : > { %v2076_v1 = vpop.f32.mrf.mxu0 }
 0x6c0   : > { %v2079_v39 = vpop.f32.mrf.mxu0 }
 0x6c8   : > { %v2138_v40 = vpop.f32.mrf.mxu2 }
 0x6c9   : > { %v2139_v61 = vadd.f32 %v2138_v40, %v2073_v55  ;;  %v2165_v40 = vadd.f32 %v2164_v26, %v2163_v10 }
 0x6cb   : > { %v2156_v52 = vadd.f32 %v2595_v7, %v2139_v61  ;;  %v2166_v21 = vrot.slane %v2165_v40, 1  ;;  %v2597_v61 = vld [vmem:[%s3697_s16] ss:$0 sm:$0xff] }
 0x6cd   : > { %v2178_v2 = vsel %vm796_vm3, %v2156_v52, 0.0  ;;  %v2167_v28 = vadd.f32 %v2166_v21, %v2165_v40 }
 0x707   : > { %v2129_v25 = vpop.f32.mrf.mxu1 }
 0x708   : > { %v2130_v47 = vadd.f32 %v2129_v25, %v2064_v62 }
 0x70a   : > { %v2153_v50 = vadd.f32 %v2595_v7, %v2130_v47 }
 0x70c   : > { %v2168_v42 = vsel %vm796_vm3, %v2153_v50, 0.0  ;;  %v2236_v50 = vld [vmem:[%s3696_s15] sm:$0xff] }
 0x70d   : > { %v2141_v44 = vpop.f32.mrf.mxu2 }
 0x70e   : > { %v2142_v37 = vadd.f32 %v2141_v44, %v2076_v1 }
 0x70f   : > { %v2132_v5 = vpop.f32.mrf.mxu1 }
 0x710   : > { %v2133_v8 = vadd.f32 %v2132_v5, %v2067_v11  ;;  %v2157_v57 = vadd.f32 %v2595_v7, %v2142_v37  ;;  %v2238_v5 = vld [vmem:[%s3696_s15 + $0x10] sm:$0xff] }
 0x711   : > { %2260 = vmatpush.msra.mxu3 %v2238_v5 }
 0x712   : > { %v2154_v36 = vadd.f32 %v2595_v7, %v2133_v8  ;;  %v2186_v6 = vsel %vm796_vm3, %v2157_v57, 0.0  ;;  %v2596_v8 = vld [vmem:[%s3695_s14] ss:$0 sm:$0xff] }
 0x713   : > { %2261 = vmatpush.msra.mxu3 %v2237_v3 }
 0x714   : > { %v2169_v19 = vsel %vm796_vm3, %v2154_v36, 0.0 }
 0x715   : > { %v2170_v29 = vadd.f32 %v2169_v19, %v2168_v42  ;;  %v2144_v43 = vpop.f32.mrf.mxu2  ;;  %2262 = vmatpush.msra.mxu3 %v2236_v50  ;;  %v1610_v42 = vmul.f32 %v3466_v58, %v3326_v35  ;;  %v1387_v35 = vmul.f32 %v3485_v24, %v3123_v12  ;;  %v1309_v24 = vsel %vm3181_vm9, %v3271_v4, 0.0 }
 0x716   : > { %v2145_v33 = vadd.f32 %v2144_v43, %v2079_v39 }
 0x717   : > { %v2171_v34 = vrot.slane %v2170_v29, 4  ;;  %v2135_v0 = vpop.f32.mrf.mxu1  ;;  %v1620_v43 = vsub.f32 %v1610_v42, %v3447_v56  ;;  %v1391_v52 = vmul.f32 %v1387_v35, %v3123_v12  ;;  %v1312_v12 = vsel %vm3197_vm10, %v3251_v14, 0.0 }
 0x718   : > { %v2158_v31 = vadd.f32 %v2595_v7, %v2145_v33  ;;  %v2136_v53 = vadd.f32 %v2135_v0, %v2070_v51  ;;  %v1612_v33 = vmul.f32 %v3502_v15, %v3366_v63  ;;  %v1321_v15 = vsel %vm936_vm4, %v1309_v24, 0.0 }
 0x719   : > { %v2172_v60 = vadd.f32 %v2171_v34, %v2170_v29  ;;  %v1628_v57 = vmul.f32 %v1620_v43, %v1620_v43 }
 0x71a   : > { %v2187_v17 = vsel %vm796_vm3, %v2158_v31, 0.0  ;;  %v2155_v49 = vadd.f32 %v2595_v7, %v2136_v53  ;;  %v1622_v0 = vsub.f32 %v1612_v33, %v3447_v56  ;;  %v1385_v31 = vpop.permute.xlu2 %1384 }
 0x71b   : > { %v2173_v59 = vrot.slane %v2172_v60, 2  ;;  %v2188_v23 = vadd.f32 %v2187_v17, %v2186_v6  ;;  %v1642_v34 = vsel %vm936_vm4, %v1628_v57, 0.0  ;;  %v1390_v53 = vmul.f32 %v1385_v31, %v3136_v22 }
 0x71c   : > { %v2177_v62 = vsel %vm796_vm3, %v2155_v49, 0.0  ;;  %v1630_v10 = vmul.f32 %v1622_v0, %v1622_v0  ;;  %v1330_v6 = vsel %vm936_vm4, %v1312_v12, 0.0 }
 0x71d   : > { %v2189_v11 = vrot.slane %v2188_v23, 4  ;;  %v2179_v32 = vadd.f32 %v2178_v2, %v2177_v62  ;;  %v2174_v45 = vadd.f32 %v2173_v59, %v2172_v60  ;;  %v1395_v60 = vsel %vm936_vm4, %v1391_v52, 0.0 }
 0x71e   : > { %v1648_v58 = vsel %vm936_vm4, %v1630_v10, 0.0  ;;  %v1394_v63 = vmul.f32 %v1390_v53, %v3136_v22 }
 0x71f   : > { %v2190_v55 = vadd.f32 %v2189_v11, %v2188_v23  ;;  %v2180_v48 = vrot.slane %v2179_v32, 4  ;;  %v2175_v20 = vrot.slane %v2174_v45, 1  ;;  %v1653_v11 = vpop.xlane.xlu0 %1652 }
 0x720   : > { %v1404_v56 = vsel %vm936_vm4, %v1394_v63, 0.0 }
 0x721   : > { %v2191_v51 = vrot.slane %v2190_v55, 2  ;;  %v2181_v9 = vadd.f32 %v2180_v48, %v2179_v32  ;;  %v2176_v41 = vadd.f32 %v2175_v20, %v2174_v45 }
 0x722   : > { %v1635_v4 = vpop.xlane.xlu2 %1634 }
 0x723   : > { %v2192_v25 = vadd.f32 %v2191_v51, %v2190_v55  ;;  %v2182_v16 = vrot.slane %v2181_v9, 2  ;;  %v2208_v44 = vsel %vm2207_vm2, %v2176_v41, %v2167_v28  ;;  %v1657_v45 = vadd.f32 %v1638_v38, %v1635_v4 }
 0x725   : > { %v2183_v7 = vadd.f32 %v2182_v16, %v2181_v9  ;;  %v2193_v18 = vrot.slane %v2192_v25, 1  ;;  %v1658_v40 = vrot.slane %v1657_v45, 4 }
 0x727   : > { %v2184_v1 = vrot.slane %v2183_v7, 1  ;;  %v2194_v30 = vadd.f32 %v2193_v18, %v2192_v25  ;;  %v1659_v16 = vadd.f32 %v1658_v40, %v1657_v45  ;;  %v1400_v21 = vpop.xlane.xlu0 %1399 }
 0x729   : > { %v2185_v47 = vadd.f32 %v2184_v1, %v2183_v7  ;;  %v1660_v28 = vrot.slane %v1659_v16, 2 }
 0x72a   : > { %v1641_v23 = vpop.xlane.xlu2 %1640 }
 0x72b   : > { %v2210_v54 = vsel %vm2209_vm5, %v2185_v47, %v2208_v44 }
 0x72c   : > { %v2212_v13 = vsel %vm2211_vm6, %v2194_v30, %v2210_v54  ;;  %v1661_v54 = vadd.f32 %v1660_v28, %v1659_v16 }
 0x72d   : > { %2499 = vmatmul.msk.f32.vlgmr.msra.gmra.mxu2 %vm796_vm3, %v2212_v13 }
 0x72f   : > { %v1317_v3 = vpop.xlane.xlu0 %1316 }
 0x732   : > { %v1647_v2 = vpop.xlane.xlu2 %1646 }
 0x73a   : > { %v1656_v14 = vpop.xlane.xlu2 %1655 }
 0x73b   : > { %v1678_v25 = vadd.f32 %v1656_v14, %v1653_v11 }
 0x73d   : > { %v1679_v1 = vrot.slane %v1678_v25, 4 }
 0x73f   : > { %v1680_v44 = vadd.f32 %v1679_v1, %v1678_v25 }
 0x742   : > { %v1403_v9 = vpop.xlane.xlu2 %1402 }
 0x743   : > { %v1419_v10 = vrot.slane %v1403_v9, 4 }
 0x74a   : > { %v1320_v13 = vpop.xlane.xlu2 %1319 }
 0x752   : > { %v1329_v43 = vpop.xlane.xlu2 %1328 }
 0x7b0   : > { %v2232_v37 = vpop.f32.mrf.mxu2 }
 0x7b1   : > { %v2233_v36 = vadd.f32 %v2596_v8, %v2232_v37  ;;  %v1681_v8 = vrot.slane %v1680_v44, 2 }
 0x7b3   : > { %v2235_v27 = vmax.f32 %v2233_v36, 0.0  ;;  %v1662_v36 = vrot.slane %v1661_v54, 1  ;;  %v1682_v42 = vadd.f32 %v1681_v8, %v1680_v44 }
 0x7b5   : > { %2500 = vmatmul.msk.f32.vlgmr.msra.gmra.mxu3 %vm796_vm3, %v2235_v27  ;;  %v1683_v33 = vrot.slane %v1682_v42, 1 }
 0x7b7   : > { %v3607_v52 = vadd.f32 %v1683_v33, %v1682_v42 }
 0x7b9   : > { %vm1728_vm12 = vcmp.eq.f32.partialorder %v3607_v52, inf  ;;  %vm1730_vm13 = vcmp.eq.f32.partialorder %v3607_v52, 0.0 }
 0x838   : > { %v2264_v19 = vpop.f32.mrf.mxu3 }
 0x839   : > { %v2265_v39 = vadd.f32 %v2597_v61, %v2264_v19  ;;  %v3598_v19 = vadd.f32 %v1662_v36, %v1661_v54 }
 0x83b   : > { %v2268_v29 = vsel %vm2267_vm7, %v2265_v39, -inf  ;;  %vm1692_vm3 = vcmp.eq.f32.partialorder %v3598_v19, inf  ;;  %vm1694_vm11 = vcmp.eq.f32.partialorder %v3598_v19, 0.0 }
 0x83c   : > { %2269 = vmax.xlane.f32.xlu1 %v2268_v29  ;;  %v1413_v29 = vrot.slane %v1400_v21, 4 }
 0x844   : > { %1643 = vadd.xlane.f32.xlu1 %v1642_v34  ;;  %v1326_v34 = vpop.xlane.xlu0 %1325 }
 0x84c   : > { %1649 = vadd.xlane.f32.xlu1 %v1648_v58  ;;  %v1414_v58 = vadd.f32 %v1413_v29, %v1400_v21  ;;  %v1335_v38 = vpop.xlane.xlu0 %1334 }
 0x854   : > { %1396 = vadd.xlane.f32.xlu1 %v1395_v60 }
 0x85c   : > { %1405 = vadd.xlane.f32.xlu1 %v1404_v56  ;;  %v1420_v56 = vadd.f32 %v1419_v10, %v1403_v9 }
 0x864   : > { %1322 = vadd.xlane.f32.xlu1 %v1321_v15  ;;  %v1415_v15 = vrot.slane %v1414_v58, 2 }
 0x86c   : > { %1331 = vadd.xlane.f32.xlu1 %v1330_v6  ;;  %v1339_v6 = vadd.f32 %v1320_v13, %v1317_v3 }
 0x86e   : > { %v1340_v11 = vrot.slane %v1339_v6, 4 }
 0x8af   : > { %v2270_v17 = vpop.xlane.xlu1 %2269 }
 0x8b0   : > { %v3594_v49 = vsub.f32 %v2265_v39, %v2270_v17 }
 0x8b2   : > { %v2272_v22 = vmul.f32 1.442695, %v3594_v49 }
 0x8b4   : > { %2654 = vpow2.f32 %v2272_v22 }
 0x8b5   : > { %2656 = vrsqrt.f32 %v3598_v19 }
 0x8b7   : > { %v1644_v26 = vpop.xlane.xlu1 %1643 }
 0x8b8   : > { %v1664_v55 = vadd.f32 %v1644_v26, %v1641_v23  ;;  %v1421_v26 = vrot.slane %v1420_v56, 2 }
 0x8ba   : > { %v2655_v59 = vpop.eup %2654  ;;  %v1665_v51 = vrot.slane %v1664_v55, 4 }
 0x8bb   : > { %v2274_v46 = vsel %vm2267_vm7, %v2655_v59, 0.0  ;;  %v2657_v24 = vpop.eup %2656  ;;  %v1338_v59 = vpop.xlane.xlu2 %1337 }
 0x8bc   : > { %2275 = vadd.xlane.f32.xlu1 %v2274_v46  ;;  %v1666_v7 = vadd.f32 %v1665_v51, %v1664_v55 }
 0x8be   : > { %v1667_v47 = vrot.slane %v1666_v7, 2 }
 0x8bf   : > { %v1650_v62 = vpop.xlane.xlu1 %1649 }
 0x8c0   : > { %v1671_v48 = vadd.f32 %v1650_v62, %v1647_v2  ;;  %v1668_v5 = vadd.f32 %v1667_v47, %v1666_v7  ;;  %v1686_v2 = vmul.f32 %v2657_v24, %v3598_v19  ;;  %v1416_v62 = vadd.f32 %v1415_v15, %v1414_v58 }
 0x8c1   : > { %v1341_v7 = vadd.f32 %v1340_v11, %v1339_v6 }
 0x8c2   : > { %v1672_v20 = vrot.slane %v1671_v48, 4  ;;  %v1669_v27 = vrot.slane %v1668_v5, 1  ;;  %v1417_v25 = vrot.slane %v1416_v62, 1  ;;  %v1687_v16 = vmul.f32 %v2657_v24, %v1686_v2 }
 0x8c4   : > { %v1673_v18 = vadd.f32 %v1672_v20, %v1671_v48  ;;  %v3600_v39 = vadd.f32 %v1669_v27, %v1668_v5  ;;  %v1422_v20 = vadd.f32 %v1421_v26, %v1420_v56  ;;  %v1418_v13 = vadd.f32 %v1417_v25, %v1416_v62 }
 0x8c5   : > { %v1688_v5 = vmul.f32 0.5, %v1687_v16 }
 0x8c6   : > { %v1674_v30 = vrot.slane %v1673_v18, 2  ;;  %2658 = vrsqrt.f32 %v3600_v39  ;;  %v1423_v54 = vrot.slane %v1422_v20, 1  ;;  %vm1704_vm4 = vcmp.eq.f32.partialorder %v3600_v39, inf }
 0x8c7   : > { %v1397_v32 = vpop.xlane.xlu1 %1396  ;;  %v1689_v33 = vsub.f32 1.5, %v1688_v5  ;;  %vm1706_vm10 = vcmp.eq.f32.partialorder %v3600_v39, 0.0 }
 0x8c8   : > { %v1675_v50 = vadd.f32 %v1674_v30, %v1673_v18  ;;  %v1407_v0 = vrot.slane %v1397_v32, 4 }
 0x8ca   : > { %v1676_v61 = vrot.slane %v1675_v50, 1  ;;  %v1408_v53 = vadd.f32 %v1407_v0, %v1397_v32  ;;  %v1360_v32 = vadd.f32 %v1338_v59, %v1335_v38 }
 0x8cc   : > { %v3602_v57 = vadd.f32 %v1676_v61, %v1675_v50  ;;  %v2659_v12 = vpop.eup %2658  ;;  %v1409_v46 = vrot.slane %v1408_v53, 2  ;;  %v1342_v50 = vrot.slane %v1341_v7, 2 }
 0x8cd   : > { %v1698_v14 = vmul.f32 %v2659_v12, %v3600_v39 }
 0x8ce   : > { %2660 = vrsqrt.f32 %v3602_v57  ;;  %v1410_v48 = vadd.f32 %v1409_v46, %v1408_v53  ;;  %v1343_v0 = vadd.f32 %v1342_v50, %v1341_v7  ;;  %vm1716_vm9 = vcmp.eq.f32.partialorder %v3602_v57, inf }
 0x8cf   : > { %v1406_v41 = vpop.xlane.xlu1 %1405  ;;  %2662 = vrsqrt.f32 %v3607_v52  ;;  %v1699_v21 = vmul.f32 %v2659_v12, %v1698_v14  ;;  %vm1718_vm8 = vcmp.eq.f32.partialorder %v3602_v57, 0.0  ;;  %v1731_v50 = vand.u32 2147483648, %v3607_v52 }
 0x8d0   : > { %v1425_v60 = vrot.slane %v1406_v41, 4  ;;  %v1411_v28 = vrot.slane %v1410_v48, 1  ;;  %2664 = vrcp.f32 %v1418_v13  ;;  %v1344_v15 = vrot.slane %v1343_v0, 1 }
 0x8d1   : > { %v1700_v3 = vmul.f32 0.5, %v1699_v21 }
 0x8d2   : > { %v1426_v4 = vadd.f32 %v1425_v60, %v1406_v41  ;;  %v1361_v41 = vrot.slane %v1360_v32, 4  ;;  %v1412_v27 = vadd.f32 %v1411_v28, %v1410_v48  ;;  %v1345_v14 = vadd.f32 %v1344_v15, %v1343_v0 }
 0x8d4   : > { %v2661_v22 = vpop.eup %2660  ;;  %v1427_v40 = vrot.slane %v1426_v4, 2  ;;  %v1362_v8 = vadd.f32 %v1361_v41, %v1360_v32  ;;  %2666 = vrcp.f32 %v1412_v27  ;;  %v1719_v41 = vand.u32 2147483648, %v3602_v57 }
 0x8d5   : > { %v1710_v55 = vmul.f32 %v2661_v22, %v3602_v57  ;;  %v2663_v9 = vpop.eup %2662 }
 0x8d6   : > { %v1428_v47 = vadd.f32 %v1427_v40, %v1426_v4  ;;  %v1722_v44 = vmul.f32 %v2663_v9, %v3607_v52  ;;  %v1363_v10 = vrot.slane %v1362_v8, 2  ;;  %v2665_v46 = vpop.eup %2664 }
 0x8d7   : > { %v1323_v37 = vpop.xlane.xlu1 %1322  ;;  %v1711_v1 = vmul.f32 %v2661_v22, %v1710_v55 }
 0x8d8   : > { %v1346_v31 = vadd.f32 %v1326_v34, %v1323_v37  ;;  %v1429_v61 = vrot.slane %v1428_v47, 1  ;;  %v1723_v29 = vmul.f32 %v2663_v9, %v1722_v44  ;;  %v1701_v34 = vsub.f32 1.5, %v1700_v3 }
 0x8d9   : > { %v1712_v36 = vmul.f32 0.5, %v1711_v1  ;;  %v1364_v6 = vadd.f32 %v1363_v10, %v1362_v8 }
 0x8da   : > { %v1347_v17 = vrot.slane %v1346_v31, 4  ;;  %v1724_v60 = vmul.f32 0.5, %v1723_v29  ;;  %v1702_v56 = vmul.f32 %v2659_v12, %v1701_v34  ;;  %v2667_v26 = vpop.eup %2666 }
 0x8db   : > { %v1713_v58 = vsub.f32 1.5, %v1712_v36  ;;  %v1365_v11 = vrot.slane %v1364_v6, 1 }
 0x8dc   : > { %v1348_v45 = vadd.f32 %v1347_v17, %v1346_v31  ;;  %v1430_v31 = vadd.f32 %v1429_v61, %v1428_v47  ;;  %v1703_v62 = vmul.f32 %v1702_v56, %v3600_v39 }
 0x8dd   : > { %v1714_v59 = vmul.f32 %v2661_v22, %v1713_v58  ;;  %v1435_v22 = vmul.f32 %v2667_v26, %v1345_v14  ;;  %v1366_v25 = vadd.f32 %v1365_v11, %v1364_v6 }
 0x8de   : > { %v1349_v18 = vrot.slane %v1348_v45, 2 }
 0x8df   : > { %v1332_v35 = vpop.xlane.xlu1 %1331  ;;  %v1439_v1 = vsub.f32 0.0, %v1435_v22 }
 0x8e0   : > { %v1353_v63 = vadd.f32 %v1332_v35, %v1329_v43  ;;  %v1350_v37 = vadd.f32 %v1349_v18, %v1348_v45  ;;  %v1424_v43 = vadd.f32 %v1423_v54, %v1422_v20  ;;  %v1705_v20 = vsel %vm1704_vm4, %v3600_v39, %v1703_v62 }
 0x8e2   : > { %v1354_v23 = vrot.slane %v1353_v63, 4  ;;  %v1351_v35 = vrot.slane %v1350_v37, 1  ;;  %2668 = vrcp.f32 %v1424_v43 }
 0x8e3   : > { %2670 = vrcp.f32 %v1430_v31 }
 0x8e4   : > { %v1355_v51 = vadd.f32 %v1354_v23, %v1353_v63  ;;  %v1690_v63 = vmul.f32 %v2657_v24, %v1689_v33  ;;  %v1352_v17 = vadd.f32 %v1351_v35, %v1350_v37  ;;  %v1725_v23 = vsub.f32 1.5, %v1724_v60 }
 0x8e5   : > { %v1715_v24 = vmul.f32 %v1714_v59, %v3602_v57 }
 0x8e6   : > { %v1356_v30 = vrot.slane %v1355_v51, 2  ;;  %v1691_v2 = vmul.f32 %v1690_v63, %v3598_v19  ;;  %v1436_v32 = vmul.f32 %v2665_v46, %v1352_v17  ;;  %v1726_v55 = vmul.f32 %v2663_v9, %v1725_v23 }
 0x8e7   : > { %v1707_v9 = vand.u32 2147483648, %v3600_v39  ;;  %v1717_v21 = vsel %vm1716_vm9, %v3602_v57, %v1715_v24 }
 0x8e8   : > { %v1357_v42 = vadd.f32 %v1356_v30, %v1355_v51  ;;  %v2669_v38 = vpop.eup %2668  ;;  %v1693_v40 = vsel %vm1692_vm3, %v3598_v19, %v1691_v2  ;;  %v1695_v51 = vand.u32 2147483648, %v3598_v19  ;;  %v1440_v16 = vsub.f32 0.0, %v1436_v32 }
 0x8e9   : > { %v2671_v48 = vpop.eup %2670  ;;  %v1727_v18 = vmul.f32 %v1726_v55, %v3607_v52  ;;  %v1708_v47 = vsel %vm1706_vm10, %v1707_v9, %v1705_v20  ;;  %v1720_v30 = vsel %vm1718_vm8, %v1719_v41, %v1717_v21 }
 0x8ea   : > { %v1358_v53 = vrot.slane %v1357_v42, 1  ;;  %v1438_v28 = vmul.f32 %v2671_v48, %v1366_v25  ;;  %v2284_v54 = vsel %vm2207_vm2, %v1440_v16, %v1439_v1  ;;  %v1696_v13 = vsel %vm1694_vm11, %v1695_v51, %v1693_v40 }
 0x8eb   : > { %v1729_v3 = vsel %vm1728_vm12, %v3607_v52, %v1727_v18  ;;  %v2292_v57 = vsel %vm2207_vm2, %v1708_v47, %v1696_v13 }
 0x8ec   : > { %v1359_v4 = vadd.f32 %v1358_v53, %v1357_v42  ;;  %v1442_v19 = vsub.f32 0.0, %v1438_v28  ;;  %v2293_v8 = vsel %vm2209_vm5, %v1720_v30, %v2292_v57  ;;  %v1732_v27 = vsel %vm1730_vm13, %v1731_v50, %v1729_v3 }
 0x8ed   : > { %v2294_v42 = vsel %vm2211_vm6, %v1732_v27, %v2293_v8 }
 0x8ee   : > { %v1437_v12 = vmul.f32 %v2669_v38, %v1359_v4 }
 0x8f0   : > { %v1441_v7 = vsub.f32 0.0, %v1437_v12 }
 0x8f2   : > { %v2285_v5 = vsel %vm2209_vm5, %v1441_v7, %v2284_v54 }
 0x8f3   : > { %v2286_v36 = vsel %vm2211_vm6, %v1442_v19, %v2285_v5 }
 0x92f   : > { %v2276_v45 = vpop.xlane.xlu1 %2275 }
 0x930   : > { %2672 = vlog2.f32 %v2276_v45 }
 0x936   : > { %v2673_v44 = vpop.eup %2672 }
 0x937   : > { %v2278_v39 = vmul.f32 0.6931472, %v2673_v44 }
 0x939   : > { %v2279_v37 = vsub.f32 %v3594_v49, %v2278_v39 }
 0x93b   : > { %v2296_v61 = vsel %vm661_vm1, %v2279_v37, %v2286_v36 }
 0x93c   : > { %v2298_v29 = vsel %vm2297_vm14, %v2296_v61, %v2294_v42 }
 0x93d   : > { %v2300_v49 = vsel %vm2299_vm15, %v2298_v29, 0.0 }
 0x93e   : > { %2301 = vst [vmem:[%s606_s21] sm:$0xf] %v2300_v49 }
 0x93f   : > { %2761 = shalt.err (!%p2758_p8)
}
 0x940   : > { %2517 = dma.vmem_to_hbm [thread:$0]  (%p2941_p5), %s2316_s26, 64, %s2318_s23, %s2303_s29  }
 0x941 PF: > { %s3724_s22 = sld [smem:[#allocation13_spill]] }
 0x942   : > { %s3725_s20 = sld [smem:[#allocation11_spill]] }
 0x947   : > { %p2534_p9 = scmp.ge.s32.totalorder %s3724_s22, 2 }
 0x948   : > { %s2329_s2 = sand.u32 1, %s3725_s20  }
 0x949   : > { %p2527_p10 = pnand %p2534_p9, %p2945_p6  ;;  %s2330_s19 = scalar_lea.sflag [#allocation4], %s2329_s2 }
 0x94b   : > { %p2528_p11 = pneg %p2527_p10 }
 0x94d   : > { %2787 = dma.done.wait (%p2528_p11), %s2330_s19, 64  }
 0x94e   : > { %2789 = vsyncadd (%p2528_p11), %s2330_s19, 4294967232  ;;  %s3727_s27 = sld [smem:[#allocation14_spill]]  ;;  %s3730_s24 = smov %s2796_s25 }
 0x94f   : > { %s3728_s28 = sld [smem:[#allocation12_spill]] }
 0x950   : > { %s3729_s26 = sld [smem:[#allocation15_spill]] }
 0x954   : > { %p29_p12 = scmp.ge.s32.totalorder %s3727_s27, 4  }
 0x955   : > { %s3731_s25 = smov %s3728_s28 }
 0x956   :  { %31 = sbr.rel (!%p29_p12) target bundleno = 9 (0x9), region = 138 }
 0x95b   :  { %2336 = vsyncpa [#allocation3], 1 }
 0x95c   :  { %2338 = vsyncpa [#allocation3 + $0x1], 1 }
 0x95d   :  { %2339 = vsyncpa [#allocation6], 1 }
 0x95e   :  { %2340 = vsyncpa [#allocation4], 1 }
 0x95f   :  { %2342 = vsyncpa [#allocation4 + $0x1], 1 }

</bundles_post_ra>
